<compile_context>
chip_gen: v6e
topology: v6e:2x2x1
jax: 0.10.0
libtpu: 0.0.40
codegen_flags: <defaults>
</compile_context>

<pallas_src>
import numpy as np
import jax
import jax.numpy as jnp
from jax.experimental import pallas as pl
from jax.experimental.pallas import tpu as pltpu


# ----------------------------- glue: 1-D upsample matrices -----------------------------

def _interp_matrix(n_in: int, n_out: int) -> np.ndarray:
    """1-D linear interpolation matrix, align_corners=True (PyTorch bilinear)."""
    A = np.zeros((n_out, n_in), np.float32)
    if n_out == 1 or n_in == 1:
        A[:, 0] = 1.0
        return A
    scale = (n_in - 1) / (n_out - 1)
    for i in range(n_out):
        src = i * scale
        lo = min(int(np.floor(src)), n_in - 2)
        frac = src - lo
        A[i, lo] += 1.0 - frac
        A[i, lo + 1] += frac
    return A


def _upsample_pad_matrix(n_in: int, n_out: int) -> np.ndarray:
    """Fuse 2x linear upsample (align_corners=True) with F.pad-style zero padding."""
    n_up = 2 * n_in
    assert n_out >= n_up
    A_up = _interp_matrix(n_in, n_up)
    lo = (n_out - n_up) // 2
    A = np.zeros((n_out, n_in), np.float32)
    A[lo:lo + n_up, :] = A_up
    return A


# ----------------------- glue: row-Toeplitz conv weights (numpy) -----------------------

def _toeplitz_conv1(w1, A_x, Cin, Cout, Cmid, W1, W2):
    """Conv1 weights in row-Toeplitz form, per dy tap.

    Input lane layout of one concat row:
        lanes [0, Cout*W2)                : skip connection x2, lane = cj*W2 + x
        lanes [Cout*W2, Cout*W2 + Cin*W1) : H-upsampled x1 (pre-W-upsample), lane = ci*W1 + w1
    The W-direction upsample/pad matrix A_x and the x zero-padding of the conv are folded
    into the weight.  Output lane layout: co*W2 + xout.
    """
    K_in = Cout * W2 + Cin * W1
    G = np.zeros((3, K_in, Cmid * W2), np.float32)
    for dy in range(3):
        for dx in range(3):
            for xout in range(W2):
                xin = xout + dx - 1
                if not (0 <= xin < W2):
                    continue                      # implicit x zero-padding
                col = np.arange(Cmid) * W2 + xout                         # (Cmid,)
                # --- skip (x2) part: torch concat channels [Cin, Cin+Cout) ---
                rows_b = np.arange(Cout) * W2 + xin                       # (Cout,)
                G[dy, rows_b[:, None], col[None, :]] += w1[dy, dx, Cin:, :]
                # --- upsampled-x1 part: fold A_x (W upsample + pad) into the weight ---
                rows_a = Cout * W2 + (np.arange(Cin)[:, None] * W1 +
                                      np.arange(W1)[None, :])             # (Cin, W1)
                contrib = (w1[dy, dx, :Cin, :][:, None, :] *
                           A_x[xin, :][None, :, None])                    # (Cin, W1, Cmid)
                G[dy, rows_a[:, :, None], col[None, None, :]] += contrib
    return G


def _toeplitz_conv2(w2, Cmid, Cout, W2):
    """Conv2 weights in row-Toeplitz form, per dy tap (lane layouts c*W2 + x)."""
    G = np.zeros((3, Cmid * W2, Cout * W2), np.float32)
    for dy in range(3):
        for dx in range(3):
            for xout in range(W2):
                xin = xout + dx - 1
                if not (0 <= xin < W2):
                    continue
                rows = np.arange(Cmid) * W2 + xin
                cols = np.arange(Cout) * W2 + xout
                G[dy, rows[:, None], cols[None, :]] += w2[dy, dx]
    return G


# ----------------------------------- kernel ---------------------------------------

def up_kernel(x1_ref, x2_ref, ayb_ref, g1_ref, g2_ref, p1bn_ref, p2bn_ref,
              ga1_ref, be1_ref, ga2_ref, be2_ref,
              out_ref,
              pad1, pad2):
    HB = out_ref.shape[0]                    # H2 * B output rows
    B = (pad1.shape[0] - HB) // 2            # halo rows per side
    n_x2 = x2_ref.shape[1]                   # Cout * W2 lanes
    n_up = x1_ref.shape[1]                   # Cin * W1 lanes
    eps = 1e-5
    slope = 0.01                             # nn.LeakyReLU default negative_slope
    f32 = jnp.float32

    # ---- zero only the 1-row y-halo of the concat buffer (no full-buffer sweep) ----
    pad1[0:B, :] = jnp.zeros((B, pad1.shape[1]), pad1.dtype)
    pad1[HB + B:HB + 2 * B, :] = jnp.zeros((B, pad1.shape[1]), pad1.dtype)

    # ---- skip connection x2 -> lanes [0, n_x2) of the concat buffer (bf16) ----
    pad1[B:B + HB, 0:n_x2] = x2_ref[...]

    # ---- separable bilinear upsample of x1: H contraction here (one batched matmul),
    #      W contraction is folded into the conv1 Toeplitz weight. ----
    u = jnp.dot(ayb_ref[...], x1_ref[...], preferred_element_type=f32)   # (HB, Cin*W1)
    pad1[B:B + HB, n_x2:n_x2 + n_up] = u.astype(pad1.dtype)

    # ---- conv1: 3 row-Toeplitz matmuls, bf16 x bf16 -> f32 (K = Cout*W2 + Cin*W1) ----
    acc1 = jnp.dot(pad1[0:HB, :], g1_ref[0], preferred_element_type=f32)
    acc1 = acc1 + jnp.dot(pad1[B:B + HB, :], g1_ref[1], preferred_element_type=f32)
    acc1 = acc1 + jnp.dot(pad1[2 * B:2 * B + HB, :], g1_ref[2], preferred_element_type=f32)

    # ---- BatchNorm1 (two-pass batch stats, biased var) + LeakyReLU, all f32 ----
    # p1bn averages within each channel's W2-lane block and broadcasts back per lane.
    mean1 = jnp.mean(jnp.dot(acc1, p1bn_ref[...], preferred_element_type=f32),
                     axis=0, keepdims=True)                       # per-channel mean, per lane
    d1 = acc1 - mean1
    var1 = jnp.mean(jnp.dot(d1 * d1, p1bn_ref[...], preferred_element_type=f32),
                    axis=0, keepdims=True)                        # biased per-channel variance
    y1 = d1 * (jax.lax.rsqrt(var1 + eps) * ga1_ref[...]) + be1_ref[...]
    y1 = jnp.where(y1 > 0, y1, slope * y1)

    # ---- mid features into second padded buffer (halo rows only zeroed) ----
    pad2[0:B, :] = jnp.zeros((B, pad2.shape[1]), pad2.dtype)
    pad2[HB + B:HB + 2 * B, :] = jnp.zeros((B, pad2.shape[1]), pad2.dtype)
    pad2[B:B + HB, :] = y1.astype(pad2.dtype)

    # ---- conv2: 3 row-Toeplitz matmuls (K = Cmid*W2, N = Cout*W2) ----
    acc2 = jnp.dot(pad2[0:HB, :], g2_ref[0], preferred_element_type=f32)
    acc2 = acc2 + jnp.dot(pad2[B:B + HB, :], g2_ref[1], preferred_element_type=f32)
    acc2 = acc2 + jnp.dot(pad2[2 * B:2 * B + HB, :], g2_ref[2], preferred_element_type=f32)

    # ---- BatchNorm2 + LeakyReLU (+ Dropout p=0 == identity) ----
    mean2 = jnp.mean(jnp.dot(acc2, p2bn_ref[...], preferred_element_type=f32),
                     axis=0, keepdims=True)
    d2 = acc2 - mean2
    var2 = jnp.mean(jnp.dot(d2 * d2, p2bn_ref[...], preferred_element_type=f32),
                    axis=0, keepdims=True)
    y2 = d2 * (jax.lax.rsqrt(var2 + eps) * ga2_ref[...]) + be2_ref[...]
    y2 = jnp.where(y2 > 0, y2, slope * y2)

    # lane-dense output: (H2*B, Cout*W2), last dim a multiple of 128 in the test case
    out_ref[...] = y2.astype(out_ref.dtype)


# ---------------------------------- wrapper ----------------------------------------

def up_forward(x1_nchw, x2_nchw, params):
    """Forward pass of Up(in_channels, out_channels, bilinear=True, first=False).

    x1_nchw: (B, Cin,  H1, W1), x2_nchw: (B, Cout, H2, W2) with H2>=2*H1, W2>=2*W1.
    Returns (B, Cout, H2, W2).  Not meant to be jitted (weight glue is built in numpy
    at call time; for repeated use, hoist the glue out and jit the pallas_call).
    """
    w1, w2, g1, b1, g2, b2 = params
    B, Cin, H1, W1 = x1_nchw.shape
    _, Cout, H2, W2 = x2_nchw.shape
    Cmid = w1.shape[-1]
    assert w1.shape[2] == Cin + Cout

    # --- trace-time glue (numpy): separable upsample operators + Toeplitz conv weights ---
    A_y = _upsample_pad_matrix(H1, H2)                                   # (H2, H1)
    A_x = _upsample_pad_matrix(W1, W2)                                   # (W2, W1)
    AyB = np.kron(A_y, np.eye(B, dtype=np.float32))                      # (H2*B, H1*B)

    w1_np = np.asarray(w1, np.float32)
    w2_np = np.asarray(w2, np.float32)
    G1 = _toeplitz_conv1(w1_np, A_x, Cin, Cout, Cmid, W1, W2)            # (3, Cout*W2+Cin*W1, Cmid*W2)
    G2 = _toeplitz_conv2(w2_np, Cmid, Cout, W2)                          # (3, Cmid*W2, Cout*W2)

    # Per-channel averaging/broadcast projections for BN stats (lane layout c*W2 + x).
    P1bn = np.kron(np.eye(Cmid, dtype=np.float32), np.ones((W2, W2), np.float32) / W2)
    P2bn = np.kron(np.eye(Cout, dtype=np.float32), np.ones((W2, W2), np.float32) / W2)

    # Per-lane tiled BN affine params.
    g1_lane = np.repeat(np.asarray(g1, np.float32)[:, None], W2, axis=1).reshape(1, Cmid * W2)
    b1_lane = np.repeat(np.asarray(b1, np.float32)[:, None], W2, axis=1).reshape(1, Cmid * W2)
    g2_lane = np.repeat(np.asarray(g2, np.float32)[:, None], W2, axis=1).reshape(1, Cout * W2)
    b2_lane = np.repeat(np.asarray(b2, np.float32)[:, None], W2, axis=1).reshape(1, Cout * W2)

    # --- boundary layout plumbing (XLA): rows = y*B + b, lanes = c*W + x ---
    x1r = jnp.transpose(x1_nchw.astype(jnp.float32), (2, 0, 1, 3)).reshape(H1 * B, Cin * W1)
    x2r = jnp.transpose(x2_nchw, (2, 0, 1, 3)).reshape(H2 * B, Cout * W2).astype(jnp.bfloat16)

    out2d = pl.pallas_call(
        up_kernel,
        out_shape=jax.ShapeDtypeStruct((H2 * B, Cout * W2), jnp.float32),
        in_specs=[pl.BlockSpec(memory_space=pltpu.MemorySpace.VMEM)] * 11,
        out_specs=pl.BlockSpec(memory_space=pltpu.MemorySpace.VMEM),
        scratch_shapes=[
            pltpu.VMEM(((H2 + 2) * B, Cout * W2 + Cin * W1), jnp.bfloat16),  # concat rows + y halo
            pltpu.VMEM(((H2 + 2) * B, Cmid * W2), jnp.bfloat16),             # mid rows + y halo
        ],
        compiler_params=pltpu.CompilerParams(vmem_limit_bytes=32 * 1024 * 1024),
    )(
        x1r, x2r,
        jnp.asarray(AyB),
        jnp.asarray(G1, dtype=jnp.bfloat16),
        jnp.asarray(G2, dtype=jnp.bfloat16),
        jnp.asarray(P1bn), jnp.asarray(P2bn),
        jnp.asarray(g1_lane), jnp.asarray(b1_lane),
        jnp.asarray(g2_lane), jnp.asarray(b2_lane),
    )

    # (H2*B, Cout*W2) with row = y*B + b, lane = c*W2 + x   ->   NCHW
    out = out2d.reshape(H2, B, Cout, W2).transpose(1, 2, 0, 3)
    return out


# ----------------------------- pure-JAX f32 reference ------------------------------

def up_reference(x1_nchw, x2_nchw, params):
    w1, w2, g1, b1, g2, b2 = params
    B, Cin, H1, W1 = x1_nchw.shape
    _, Cout, H2, W2 = x2_nchw.shape
    A_y = jnp.asarray(_upsample_pad_matrix(H1, H2))
    A_x = jnp.asarray(_upsample_pad_matrix(W1, W2))
    x1 = x1_nchw.astype(jnp.float32)
    up = jnp.einsum('yh,bchw->bcyw', A_y, x1)
    up = jnp.einsum('xw,bcyw->bcyx', A_x, up)
    x = jnp.concatenate([up, x2_nchw.astype(jnp.float32)], axis=1)       # NCHW concat
    x = jnp.transpose(x, (0, 2, 3, 1))                                   # NHWC

    def conv_bn_lrelu(h, w, g, b):
        y = jax.lax.conv_general_dilated(h, w, (1, 1), ((1, 1), (1, 1)),
                                         dimension_numbers=('NHWC', 'HWIO', 'NHWC'))
        m = jnp.mean(y, axis=(0, 1, 2), keepdims=True)
        v = jnp.mean((y - m) ** 2, axis=(0, 1, 2), keepdims=True)
        y = (y - m) * jax.lax.rsqrt(v + 1e-5) * g.reshape(1, 1, 1, -1) + b.reshape(1, 1, 1, -1)
        return jnp.where(y > 0, y, 0.01 * y)

    h = conv_bn_lrelu(x, w1, g1, b1)
    h = conv_bn_lrelu(h, w2, g2, b2)
    return jnp.transpose(h, (0, 3, 1, 2))                                # NCHW


def init_params(key, in_channels, out_channels):
    """Deterministic synthetic parameters matching Up(in, out, bilinear=True)."""
    cin_tot = in_channels + out_channels       # concat channels
    cmid = in_channels // 2                    # DoubleConv mid_channels
    k1, k2, k3, k4, k5, k6 = jax.random.split(key, 6)
    w1 = 0.1 * jax.random.normal(k1, (3, 3, cin_tot, cmid), jnp.float32)       # HWIO
    w2 = 0.1 * jax.random.normal(k2, (3, 3, cmid, out_channels), jnp.float32)  # HWIO
    g1 = 1.0 + 0.1 * jax.random.normal(k3, (cmid,), jnp.float32)
    b1 = 0.1 * jax.random.normal(k4, (cmid,), jnp.float32)
    g2 = 1.0 + 0.1 * jax.random.normal(k5, (out_channels,), jnp.float32)
    b2 = 0.1 * jax.random.normal(k6, (out_channels,), jnp.float32)
    return (w1, w2, g1, b1, g2, b2)


if __name__ == "__main__":
    # Up(in_channels=8, out_channels=8, bilinear=True): x1 is upsampled 2x, x2 is the skip.
    B, Cin, Cout = 2, 8, 8
    H1 = W1 = 8
    H2 = W2 = 16

    key = jax.random.PRNGKey(0)
    kx1, kx2, kp = jax.random.split(key, 3)
    x1 = jax.random.normal(kx1, (B, Cin, H1, W1), jnp.float32)   # NCHW like PyTorch
    x2 = jax.random.normal(kx2, (B, Cout, H2, W2), jnp.float32)  # NCHW like PyTorch
    params = init_params(kp, Cin, Cout)

    out = up_forward(x1, x2, params)
    out = jax.block_until_ready(out)
    assert out.shape == (B, Cout, H2, W2), out.shape
    assert bool(jnp.all(jnp.isfinite(out)))

    # Sanity check vs. pure-JAX f32 reference (loose tol: conv path uses bf16 operands).
    ref = up_reference(x1, x2, params)
    max_err = float(jnp.max(jnp.abs(out - ref)))
    assert max_err < 0.25, f"max abs err vs reference: {max_err}"

    print("KERNEL_OK")
</pallas_src>

<mosaic_0001>
module attributes {stable_mosaic.version = 11 : i64} {
  func.func @up_kernel(%arg0: memref<16x64xf32, #tpu.memory_space<vmem>>, %arg1: memref<32x128xbf16, #tpu.memory_space<vmem>>, %arg2: memref<32x16xf32, #tpu.memory_space<vmem>>, %arg3: memref<3x192x64xbf16, #tpu.memory_space<vmem>>, %arg4: memref<3x64x128xbf16, #tpu.memory_space<vmem>>, %arg5: memref<64x64xf32, #tpu.memory_space<vmem>>, %arg6: memref<128x128xf32, #tpu.memory_space<vmem>>, %arg7: memref<1x64xf32, #tpu.memory_space<vmem>>, %arg8: memref<1x64xf32, #tpu.memory_space<vmem>>, %arg9: memref<1x128xf32, #tpu.memory_space<vmem>>, %arg10: memref<1x128xf32, #tpu.memory_space<vmem>>, %arg11: memref<32x128xf32, #tpu.memory_space<vmem>>, %arg12: memref<36x192xbf16, #tpu.memory_space<vmem>>, %arg13: memref<36x64xbf16, #tpu.memory_space<vmem>>) attributes {dimension_semantics = [], scalar_prefetch = 0 : i64, scratch_operands = 2 : i64, tpu.core_type = #tpu.core_type<tc>} {
    %cst = arith.constant 0.000000e+00 : bf16
    %0 = vector.broadcast %cst : bf16 to vector<2x192xbf16>
    %c0 = arith.constant 0 : index
    %c0_0 = arith.constant 0 : index
    %1 = vector.load %arg12[%c0, %c0_0] : memref<36x192xbf16, #tpu.memory_space<vmem>>, vector<2x192xbf16>
    tpu.vector_store %arg12[%c0, %c0_0], %0 {strides = array<i32>} : memref<36x192xbf16, #tpu.memory_space<vmem>>, vector<2x192xbf16>,
    %cst_1 = arith.constant 0.000000e+00 : bf16
    %2 = vector.broadcast %cst_1 : bf16 to vector<2x192xbf16>
    %c34 = arith.constant 34 : index
    %c0_2 = arith.constant 0 : index
    %3 = vector.load %arg12[%c34, %c0_2] : memref<36x192xbf16, #tpu.memory_space<vmem>>, vector<2x192xbf16>
    tpu.vector_store %arg12[%c34, %c0_2], %2 {strides = array<i32>} : memref<36x192xbf16, #tpu.memory_space<vmem>>, vector<2x192xbf16>,
    %c0_3 = arith.constant 0 : index
    %c0_4 = arith.constant 0 : index
    %4 = vector.load %arg1[%c0_3, %c0_4] : memref<32x128xbf16, #tpu.memory_space<vmem>>, vector<32x128xbf16>
    %c2 = arith.constant 2 : index
    %c0_5 = arith.constant 0 : index
    %5 = vector.load %arg12[%c2, %c0_5] : memref<36x192xbf16, #tpu.memory_space<vmem>>, vector<32x128xbf16>
    tpu.vector_store %arg12[%c2, %c0_5], %4 {strides = array<i32>} : memref<36x192xbf16, #tpu.memory_space<vmem>>, vector<32x128xbf16>,
    %c0_6 = arith.constant 0 : index
    %c0_7 = arith.constant 0 : index
    %6 = vector.load %arg2[%c0_6, %c0_7] : memref<32x16xf32, #tpu.memory_space<vmem>>, vector<32x16xf32>
    %c0_8 = arith.constant 0 : index
    %c0_9 = arith.constant 0 : index
    %7 = vector.load %arg0[%c0_8, %c0_9] : memref<16x64xf32, #tpu.memory_space<vmem>>, vector<16x64xf32>
    %cst_10 = arith.constant dense<0.000000e+00> : vector<32x64xf32>
    %8 = tpu.matmul %6, %7, %cst_10 {dimension_numbers = #tpu.dot_dimension_numbers<[1], [0], [0], [1], [0, 0, 1, 1], [], []>} : vector<32x16xf32>, vector<16x64xf32>, vector<32x64xf32> -> vector<32x64xf32>
    %9 = arith.truncf %8 : vector<32x64xf32> to vector<32x64xbf16>
    %c2_11 = arith.constant 2 : index
    %c128 = arith.constant 128 : index
    %10 = vector.load %arg12[%c2_11, %c128] : memref<36x192xbf16, #tpu.memory_space<vmem>>, vector<32x64xbf16>
    tpu.vector_store %arg12[%c2_11, %c128], %9 {strides = array<i32>} : memref<36x192xbf16, #tpu.memory_space<vmem>>, vector<32x64xbf16>,
    %c0_12 = arith.constant 0 : index
    %c0_13 = arith.constant 0 : index
    %11 = vector.load %arg12[%c0_12, %c0_13] : memref<36x192xbf16, #tpu.memory_space<vmem>>, vector<32x192xbf16>
    %c0_14 = arith.constant 0 : index
    %c0_15 = arith.constant 0 : index
    %c0_16 = arith.constant 0 : index
    %12 = vector.load %arg3[%c0_14, %c0_15, %c0_16] : memref<3x192x64xbf16, #tpu.memory_space<vmem>>, vector<1x192x64xbf16>
    %13 = vector.shape_cast %12 : vector<1x192x64xbf16> to vector<192x64xbf16>
    %cst_17 = arith.constant dense<0.000000e+00> : vector<32x64xf32>
    %14 = tpu.matmul %11, %13, %cst_17 {dimension_numbers = #tpu.dot_dimension_numbers<[1], [0], [0], [1], [0, 0, 1, 1], [], []>} : vector<32x192xbf16>, vector<192x64xbf16>, vector<32x64xf32> -> vector<32x64xf32>
    %c2_18 = arith.constant 2 : index
    %c0_19 = arith.constant 0 : index
    %15 = vector.load %arg12[%c2_18, %c0_19] : memref<36x192xbf16, #tpu.memory_space<vmem>>, vector<32x192xbf16>
    %c1 = arith.constant 1 : index
    %c0_20 = arith.constant 0 : index
    %c0_21 = arith.constant 0 : index
    %16 = vector.load %arg3[%c1, %c0_20, %c0_21] : memref<3x192x64xbf16, #tpu.memory_space<vmem>>, vector<1x192x64xbf16>
    %17 = vector.shape_cast %16 : vector<1x192x64xbf16> to vector<192x64xbf16>
    %cst_22 = arith.constant dense<0.000000e+00> : vector<32x64xf32>
    %18 = tpu.matmul %15, %17, %cst_22 {dimension_numbers = #tpu.dot_dimension_numbers<[1], [0], [0], [1], [0, 0, 1, 1], [], []>} : vector<32x192xbf16>, vector<192x64xbf16>, vector<32x64xf32> -> vector<32x64xf32>
    %19 = arith.addf %14, %18 : vector<32x64xf32>
    %c4 = arith.constant 4 : index
    %c0_23 = arith.constant 0 : index
    %20 = vector.load %arg12[%c4, %c0_23] : memref<36x192xbf16, #tpu.memory_space<vmem>>, vector<32x192xbf16>
    %c2_24 = arith.constant 2 : index
    %c0_25 = arith.constant 0 : index
    %c0_26 = arith.constant 0 : index
    %21 = vector.load %arg3[%c2_24, %c0_25, %c0_26] : memref<3x192x64xbf16, #tpu.memory_space<vmem>>, vector<1x192x64xbf16>
    %22 = vector.shape_cast %21 : vector<1x192x64xbf16> to vector<192x64xbf16>
    %cst_27 = arith.constant dense<0.000000e+00> : vector<32x64xf32>
    %23 = tpu.matmul %20, %22, %cst_27 {dimension_numbers = #tpu.dot_dimension_numbers<[1], [0], [0], [1], [0, 0, 1, 1], [], []>} : vector<32x192xbf16>, vector<192x64xbf16>, vector<32x64xf32> -> vector<32x64xf32>
    %24 = arith.addf %19, %23 : vector<32x64xf32>
    %c0_28 = arith.constant 0 : index
    %c0_29 = arith.constant 0 : index
    %25 = vector.load %arg5[%c0_28, %c0_29] : memref<64x64xf32, #tpu.memory_space<vmem>>, vector<64x64xf32>
    %cst_30 = arith.constant dense<0.000000e+00> : vector<32x64xf32>
    %26 = tpu.matmul %24, %25, %cst_30 {dimension_numbers = #tpu.dot_dimension_numbers<[1], [0], [0], [1], [0, 0, 1, 1], [], []>} : vector<32x64xf32>, vector<64x64xf32>, vector<32x64xf32> -> vector<32x64xf32>
    %cst_31 = arith.constant dense<0.000000e+00> : vector<64xf32>
    %27 = vector.multi_reduction <add>, %26, %cst_31 [0] : vector<32x64xf32> to vector<64xf32>
    %28 = vector.shape_cast %27 : vector<64xf32> to vector<1x64xf32>
    %cst_32 = arith.constant 3.200000e+01 : f32
    %29 = vector.broadcast %cst_32 : f32 to vector<1x64xf32>
    %30 = arith.divf %28, %29 : vector<1x64xf32>
    %31 = vector.broadcast %30 : vector<1x64xf32> to vector<32x64xf32>
    %32 = arith.subf %24, %31 : vector<32x64xf32>
    %33 = arith.mulf %32, %32 : vector<32x64xf32>
    %c0_33 = arith.constant 0 : index
    %c0_34 = arith.constant 0 : index
    %34 = vector.load %arg5[%c0_33, %c0_34] : memref<64x64xf32, #tpu.memory_space<vmem>>, vector<64x64xf32>
    %cst_35 = arith.constant dense<0.000000e+00> : vector<32x64xf32>
    %35 = tpu.matmul %33, %34, %cst_35 {dimension_numbers = #tpu.dot_dimension_numbers<[1], [0], [0], [1], [0, 0, 1, 1], [], []>} : vector<32x64xf32>, vector<64x64xf32>, vector<32x64xf32> -> vector<32x64xf32>
    %cst_36 = arith.constant dense<0.000000e+00> : vector<64xf32>
    %36 = vector.multi_reduction <add>, %35, %cst_36 [0] : vector<32x64xf32> to vector<64xf32>
    %37 = vector.shape_cast %36 : vector<64xf32> to vector<1x64xf32>
    %cst_37 = arith.constant 3.200000e+01 : f32
    %38 = vector.broadcast %cst_37 : f32 to vector<1x64xf32>
    %39 = arith.divf %37, %38 : vector<1x64xf32>
    %cst_38 = arith.constant 9.99999974E-6 : f32
    %40 = vector.broadcast %cst_38 : f32 to vector<1x64xf32>
    %41 = arith.addf %39, %40 : vector<1x64xf32>
    %42 = math.rsqrt %41 : vector<1x64xf32>
    %c0_39 = arith.constant 0 : index
    %c0_40 = arith.constant 0 : index
    %43 = vector.load %arg7[%c0_39, %c0_40] : memref<1x64xf32, #tpu.memory_space<vmem>>, vector<1x64xf32>
    %44 = arith.mulf %42, %43 : vector<1x64xf32>
    %45 = vector.broadcast %44 : vector<1x64xf32> to vector<32x64xf32>
    %46 = arith.mulf %32, %45 : vector<32x64xf32>
    %c0_41 = arith.constant 0 : index
    %c0_42 = arith.constant 0 : index
    %47 = vector.load %arg8[%c0_41, %c0_42] : memref<1x64xf32, #tpu.memory_space<vmem>>, vector<1x64xf32>
    %48 = vector.broadcast %47 : vector<1x64xf32> to vector<32x64xf32>
    %49 = arith.addf %46, %48 : vector<32x64xf32>
    %cst_43 = arith.constant 0.000000e+00 : f32
    %50 = vector.broadcast %cst_43 : f32 to vector<32x64xf32>
    %51 = arith.cmpf ogt, %49, %50 : vector<32x64xf32>
    %cst_44 = arith.constant 0.00999999977 : f32
    %52 = vector.broadcast %cst_44 : f32 to vector<32x64xf32>
    %53 = arith.mulf %52, %49 : vector<32x64xf32>
    %54 = arith.select %51, %49, %53 : vector<32x64xi1>, vector<32x64xf32>
    %cst_45 = arith.constant 0.000000e+00 : bf16
    %55 = vector.broadcast %cst_45 : bf16 to vector<2x64xbf16>
    %c0_46 = arith.constant 0 : index
    %c0_47 = arith.constant 0 : index
    %56 = vector.load %arg13[%c0_46, %c0_47] : memref<36x64xbf16, #tpu.memory_space<vmem>>, vector<2x64xbf16>
    tpu.vector_store %arg13[%c0_46, %c0_47], %55 {strides = array<i32>} : memref<36x64xbf16, #tpu.memory_space<vmem>>, vector<2x64xbf16>,
    %cst_48 = arith.constant 0.000000e+00 : bf16
    %57 = vector.broadcast %cst_48 : bf16 to vector<2x64xbf16>
    %c34_49 = arith.constant 34 : index
    %c0_50 = arith.constant 0 : index
    %58 = vector.load %arg13[%c34_49, %c0_50] : memref<36x64xbf16, #tpu.memory_space<vmem>>, vector<2x64xbf16>
    tpu.vector_store %arg13[%c34_49, %c0_50], %57 {strides = array<i32>} : memref<36x64xbf16, #tpu.memory_space<vmem>>, vector<2x64xbf16>,
    %59 = arith.truncf %54 : vector<32x64xf32> to vector<32x64xbf16>
    %c2_51 = arith.constant 2 : index
    %c0_52 = arith.constant 0 : index
    %60 = vector.load %arg13[%c2_51, %c0_52] : memref<36x64xbf16, #tpu.memory_space<vmem>>, vector<32x64xbf16>
    tpu.vector_store %arg13[%c2_51, %c0_52], %59 {strides = array<i32>} : memref<36x64xbf16, #tpu.memory_space<vmem>>, vector<32x64xbf16>,
    %c0_53 = arith.constant 0 : index
    %c0_54 = arith.constant 0 : index
    %61 = vector.load %arg13[%c0_53, %c0_54] : memref<36x64xbf16, #tpu.memory_space<vmem>>, vector<32x64xbf16>
    %c0_55 = arith.constant 0 : index
    %c0_56 = arith.constant 0 : index
    %c0_57 = arith.constant 0 : index
    %62 = vector.load %arg4[%c0_55, %c0_56, %c0_57] : memref<3x64x128xbf16, #tpu.memory_space<vmem>>, vector<1x64x128xbf16>
    %63 = vector.shape_cast %62 : vector<1x64x128xbf16> to vector<64x128xbf16>
    %cst_58 = arith.constant dense<0.000000e+00> : vector<32x128xf32>
    %64 = tpu.matmul %61, %63, %cst_58 {dimension_numbers = #tpu.dot_dimension_numbers<[1], [0], [0], [1], [0, 0, 1, 1], [], []>} : vector<32x64xbf16>, vector<64x128xbf16>, vector<32x128xf32> -> vector<32x128xf32>
    %c2_59 = arith.constant 2 : index
    %c0_60 = arith.constant 0 : index
    %65 = vector.load %arg13[%c2_59, %c0_60] : memref<36x64xbf16, #tpu.memory_space<vmem>>, vector<32x64xbf16>
    %c1_61 = arith.constant 1 : index
    %c0_62 = arith.constant 0 : index
    %c0_63 = arith.constant 0 : index
    %66 = vector.load %arg4[%c1_61, %c0_62, %c0_63] : memref<3x64x128xbf16, #tpu.memory_space<vmem>>, vector<1x64x128xbf16>
    %67 = vector.shape_cast %66 : vector<1x64x128xbf16> to vector<64x128xbf16>
    %cst_64 = arith.constant dense<0.000000e+00> : vector<32x128xf32>
    %68 = tpu.matmul %65, %67, %cst_64 {dimension_numbers = #tpu.dot_dimension_numbers<[1], [0], [0], [1], [0, 0, 1, 1], [], []>} : vector<32x64xbf16>, vector<64x128xbf16>, vector<32x128xf32> -> vector<32x128xf32>
    %69 = arith.addf %64, %68 : vector<32x128xf32>
    %c4_65 = arith.constant 4 : index
    %c0_66 = arith.constant 0 : index
    %70 = vector.load %arg13[%c4_65, %c0_66] : memref<36x64xbf16, #tpu.memory_space<vmem>>, vector<32x64xbf16>
    %c2_67 = arith.constant 2 : index
    %c0_68 = arith.constant 0 : index
    %c0_69 = arith.constant 0 : index
    %71 = vector.load %arg4[%c2_67, %c0_68, %c0_69] : memref<3x64x128xbf16, #tpu.memory_space<vmem>>, vector<1x64x128xbf16>
    %72 = vector.shape_cast %71 : vector<1x64x128xbf16> to vector<64x128xbf16>
    %cst_70 = arith.constant dense<0.000000e+00> : vector<32x128xf32>
    %73 = tpu.matmul %70, %72, %cst_70 {dimension_numbers = #tpu.dot_dimension_numbers<[1], [0], [0], [1], [0, 0, 1, 1], [], []>} : vector<32x64xbf16>, vector<64x128xbf16>, vector<32x128xf32> -> vector<32x128xf32>
    %74 = arith.addf %69, %73 : vector<32x128xf32>
    %c0_71 = arith.constant 0 : index
    %c0_72 = arith.constant 0 : index
    %75 = vector.load %arg6[%c0_71, %c0_72] : memref<128x128xf32, #tpu.memory_space<vmem>>, vector<128x128xf32>
    %cst_73 = arith.constant dense<0.000000e+00> : vector<32x128xf32>
    %76 = tpu.matmul %74, %75, %cst_73 {dimension_numbers = #tpu.dot_dimension_numbers<[1], [0], [0], [1], [0, 0, 1, 1], [], []>} : vector<32x128xf32>, vector<128x128xf32>, vector<32x128xf32> -> vector<32x128xf32>
    %cst_74 = arith.constant dense<0.000000e+00> : vector<128xf32>
    %77 = vector.multi_reduction <add>, %76, %cst_74 [0] : vector<32x128xf32> to vector<128xf32>
    %78 = vector.shape_cast %77 : vector<128xf32> to vector<1x128xf32>
    %cst_75 = arith.constant 3.200000e+01 : f32
    %79 = vector.broadcast %cst_75 : f32 to vector<1x128xf32>
    %80 = arith.divf %78, %79 : vector<1x128xf32>
    %81 = vector.broadcast %80 : vector<1x128xf32> to vector<32x128xf32>
    %82 = arith.subf %74, %81 : vector<32x128xf32>
    %83 = arith.mulf %82, %82 : vector<32x128xf32>
    %c0_76 = arith.constant 0 : index
    %c0_77 = arith.constant 0 : index
    %84 = vector.load %arg6[%c0_76, %c0_77] : memref<128x128xf32, #tpu.memory_space<vmem>>, vector<128x128xf32>
    %cst_78 = arith.constant dense<0.000000e+00> : vector<32x128xf32>
    %85 = tpu.matmul %83, %84, %cst_78 {dimension_numbers = #tpu.dot_dimension_numbers<[1], [0], [0], [1], [0, 0, 1, 1], [], []>} : vector<32x128xf32>, vector<128x128xf32>, vector<32x128xf32> -> vector<32x128xf32>
    %cst_79 = arith.constant dense<0.000000e+00> : vector<128xf32>
    %86 = vector.multi_reduction <add>, %85, %cst_79 [0] : vector<32x128xf32> to vector<128xf32>
    %87 = vector.shape_cast %86 : vector<128xf32> to vector<1x128xf32>
    %cst_80 = arith.constant 3.200000e+01 : f32
    %88 = vector.broadcast %cst_80 : f32 to vector<1x128xf32>
    %89 = arith.divf %87, %88 : vector<1x128xf32>
    %cst_81 = arith.constant 9.99999974E-6 : f32
    %90 = vector.broadcast %cst_81 : f32 to vector<1x128xf32>
    %91 = arith.addf %89, %90 : vector<1x128xf32>
    %92 = math.rsqrt %91 : vector<1x128xf32>
    %c0_82 = arith.constant 0 : index
    %c0_83 = arith.constant 0 : index
    %93 = vector.load %arg9[%c0_82, %c0_83] : memref<1x128xf32, #tpu.memory_space<vmem>>, vector<1x128xf32>
    %94 = arith.mulf %92, %93 : vector<1x128xf32>
    %95 = vector.broadcast %94 : vector<1x128xf32> to vector<32x128xf32>
    %96 = arith.mulf %82, %95 : vector<32x128xf32>
    %c0_84 = arith.constant 0 : index
    %c0_85 = arith.constant 0 : index
    %97 = vector.load %arg10[%c0_84, %c0_85] : memref<1x128xf32, #tpu.memory_space<vmem>>, vector<1x128xf32>
    %98 = vector.broadcast %97 : vector<1x128xf32> to vector<32x128xf32>
    %99 = arith.addf %96, %98 : vector<32x128xf32>
    %cst_86 = arith.constant 0.000000e+00 : f32
    %100 = vector.broadcast %cst_86 : f32 to vector<32x128xf32>
    %101 = arith.cmpf ogt, %99, %100 : vector<32x128xf32>
    %cst_87 = arith.constant 0.00999999977 : f32
    %102 = vector.broadcast %cst_87 : f32 to vector<32x128xf32>
    %103 = arith.mulf %102, %99 : vector<32x128xf32>
    %104 = arith.select %101, %99, %103 : vector<32x128xi1>, vector<32x128xf32>
    %c0_88 = arith.constant 0 : index
    %c0_89 = arith.constant 0 : index
    %105 = vector.load %arg11[%c0_88, %c0_89] : memref<32x128xf32, #tpu.memory_space<vmem>>, vector<32x128xf32>
    tpu.vector_store %arg11[%c0_88, %c0_89], %104 {strides = array<i32>} : memref<32x128xf32, #tpu.memory_space<vmem>>, vector<32x128xf32>,
    return
  }
}

</mosaic_0001>

<bundles_post_ra>
// kernel: tpu_custom_call.1
= control target key start
LH: loop header
LB: loop body
LE: loop exit
PB: predicated region body
PF: predicated region fallthrough
CT: control target
= control target key end

     0   :  { %vm86_vm0 = vcmask 130048   ;;  %v2161_v5 = vmov 0   ;;  %s2657_s0 = inlined_call_operand.vmem [shape: f32[16,64], index: 0, kind: input, shape index: {}]   ;;  %s2658_s1 = inlined_call_operand.vmem [shape: bf16[32,128], index: 1, kind: input, shape index: {}]   ;;  %s2659_s2 = inlined_call_operand.vmem [shape: f32[32,16], index: 2, kind: input, shape index: {}]   ;;  %s2660_s3 = inlined_call_operand.vmem [shape: bf16[3,192,64], index: 3, kind: input, shape index: {}]   ;;  %s2661_s4 = inlined_call_operand.vmem [shape: bf16[3,64,128], index: 4, kind: input, shape index: {}]   ;;  %s2662_s5 = inlined_call_operand.vmem [shape: f32[64,64], index: 5, kind: input, shape index: {}]   ;;  %s2663_s6 = inlined_call_operand.vmem [shape: f32[128,128], index: 6, kind: input, shape index: {}]   ;;  %s2664_s7 = inlined_call_operand.vmem [shape: f32[1,64], index: 7, kind: input, shape index: {}]   ;;  %s2665_s8 = inlined_call_operand.vmem [shape: f32[1,64], index: 8, kind: input, shape index: {}]   ;;  %s2666_s9 = inlined_call_operand.vmem [shape: f32[1,128], index: 9, kind: input, shape index: {}]   ;;  %s2667_s10 = inlined_call_operand.vmem [shape: f32[1,128], index: 10, kind: input, shape index: {}]   ;;  %s2668_s11 = inlined_call_operand.hbm [shape: f32[32,128], index: 11, kind: output, shape index: {}]  }
   0x1   :  { %v85_v0 = vld [vmem:[%s2657_s0 + $0x8] sm:$0xff]  ;;  %v84_v1 = vld [vmem:[%s2657_s0] sm:$0xff]  ;;  %v2068_v4 = vld [vmem:[%s2660_s3 + $0x38] sm:$0xff]   ;;  %388 = vmatprep.subr.bf16.mxu1 %v2161_v5 }
   0x2   :  { %v80_v2 = vld [vmem:[%s2659_s2] sm:$0xff]  ;;  %1898 = vmatprep.subr.mxu0 %v85_v0  ;;  %v81_v3 = vld [vmem:[%s2659_s2 + $0x8] sm:$0xff]  ;;  %v82_v6 = vld [vmem:[%s2659_s2 + $0x10] sm:$0xff] }
   0x3   :  { %1902 = vmatprep.mubr.msk.f32.mxu0 %vm86_vm0, %v80_v2  ;;  %1899 = vmatpush3.msra.mxu0 %v85_v0  ;;  %v2070_v7 = vld [vmem:[%s2660_s3 + $0x98] sm:$0xff]   ;;  %v2069_v9 = vld [vmem:[%s2660_s3 + $0x30] sm:$0xff]   ;;  %v2071_v11 = vld [vmem:[%s2660_s3 + $0x28] sm:$0xff]  }
   0x4   :  { %1900 = vmatprep.subr.mxu0 %v84_v1  ;;  %v83_v8 = vld [vmem:[%s2659_s2 + $0x18] sm:$0xff]  ;;  %389 = vmatpush1.bf16.msra.mxu1 %v2070_v7  ;;  %v2072_v10 = vld [vmem:[%s2660_s3 + $0x90] sm:$0xff]   ;;  %v2074_v12 = vld [vmem:[%s2660_s3 + $0x88] sm:$0xff]  }
   0x5   :  { %1901 = vmatpush3.msra.mxu0 %v84_v1  ;;  %390 = vmatprep.subr.bf16.mxu1 %v2161_v5  ;;  %v2073_v13 = vld [vmem:[%s2660_s3 + $0x20] sm:$0xff]   ;;  %v2075_v15 = vld [vmem:[%s2660_s3 + $0x18] sm:$0xff]   ;;  %v2077_v17 = vld [vmem:[%s2660_s3 + $0x10] sm:$0xff]  }
   0x6   :  { %1903 = vmatmul.mubr.msk.f32.vlgmr.msra.gmra.mxu0 %vm86_vm0, %v81_v3  ;;  %522 = vmatprep.subr.bf16.mxu0 %v2161_v5  ;;  %v2076_v14 = vld [vmem:[%s2660_s3 + $0x80] sm:$0xff]   ;;  %v2078_v16 = vld [vmem:[%s2660_s3 + $0x78] sm:$0xff]   ;;  %v2079_v18 = vld [vmem:[%s2660_s3 + $0x8] sm:$0xff]  }
   0x7   :  { %1905 = vmatprep.mubr.msk.f32.mxu0 %vm86_vm0, %v82_v6  ;;  %523 = vmatpush1.bf16.msra.mxu0 %v2068_v4 }
   0x8   :  { %524 = vmatprep.subr.bf16.mxu0 %v2161_v5  ;;  %391 = vmatpush1.bf16.msra.mxu1 %v2072_v10 }
   0x9   :  { %392 = vmatprep.subr.bf16.mxu1 %v2161_v5 }
   0xa   :  { %1906 = vmatmul.mubr.msk.f32.gmra.mxu0 %vm86_vm0, %v83_v8 }
   0xb   :  { %525 = vmatpush1.bf16.msra.mxu0 %v2069_v9 }
   0xc   :  { %526 = vmatprep.subr.bf16.mxu0 %v2161_v5  ;;  %393 = vmatpush1.bf16.msra.mxu1 %v2074_v12 }
   0xd   :  { %394 = vmatprep.subr.bf16.mxu1 %v2161_v5 }
   0xf   :  { %527 = vmatpush1.bf16.msra.mxu0 %v2071_v11 }
  0x10   :  { %528 = vmatprep.subr.bf16.mxu0 %v2161_v5  ;;  %395 = vmatpush1.bf16.msra.mxu1 %v2076_v14 }
  0x11   :  { %396 = vmatprep.subr.bf16.mxu1 %v2161_v5 }
  0x13   :  { %529 = vmatpush1.bf16.msra.mxu0 %v2073_v13 }
  0x14   :  { %530 = vmatprep.subr.bf16.mxu0 %v2161_v5  ;;  %397 = vmatpush1.bf16.msra.mxu1 %v2078_v16 }
  0x15   :  { %398 = vmatprep.subr.bf16.mxu1 %v2161_v5 }
  0x17   :  { %531 = vmatpush1.bf16.msra.mxu0 %v2075_v15 }
  0x18   :  { %532 = vmatprep.subr.bf16.mxu0 %v2161_v5 }
  0x1b   :  { %533 = vmatpush1.bf16.msra.mxu0 %v2077_v17 }
  0x1c   :  { %534 = vmatprep.subr.bf16.mxu0 %v2161_v5 }
  0x1f   :  { %535 = vmatpush1.bf16.msra.mxu0 %v2079_v18 }
  0x20   :  { %536 = vmatprep.subr.bf16.mxu0 %v2161_v5 }
  0x21   :  { %16 = vsyncpa [#allocation5], 0  ;;  %v2080_v19 = vld [vmem:[%s2660_s3 + $0x70] sm:$0xff]   ;;  %v2081_v20 = vld [vmem:[%s2660_s3] sm:$0xff]   ;;  %vm40_vm1 = vcmask 1040384   ;;  %vm41_vm2 = vcmask 520196  }
  0x22   :  { %399 = vmatpush1.bf16.msra.mxu1 %v2080_v19  ;;  %v2082_v21 = vld [vmem:[%s2660_s3 + $0x68] sm:$0xff]   ;;  %v2083_v22 = vld [vmem:[%s2660_s3 + $0x58] sm:$0xff]   ;;  %v48_v23 = vld [vmem:[%s2658_s1] sm:$0xf]  ;;  %vm57_vm3 = vcmask 1044484   ;;  %vm218_vm6 = vcmask 516096  }
  0x23   :  { %400 = vmatprep.subr.bf16.mxu1 %v2161_v5  ;;  %537 = vmatpush1.bf16.msra.mxu0 %v2081_v20  ;;  %v2084_v24 = vld [vmem:[%s2660_s3 + $0x60] sm:$0xff]   ;;  %v59_v25 = vrot.slane %v48_v23, 7  ;;  %vm42_vm4 = vmor %vm41_vm2, %vm40_vm1  ;;  %v51_v27 = vld [vmem:[%s2658_s1 + $0xc] sm:$0xf]  ;;  %1026 = vst.msk [vmem:[#allocation3] sm:$0x1] %vm218_vm6, %v2161_v5 }
  0x24   :  { %546 = vmatprep.subr.bf16.mxu0 %v2161_v5  ;;  %v49_v26 = vld [vmem:[%s2658_s1 + $0x4] sm:$0xf]  ;;  %43 = vst.msk [vmem:[#allocation2] sm:$0x11] %vm42_vm4, %v2161_v5  ;;  %vm2325_vm5 = vmor %vm40_vm1, %vm57_vm3  ;;  %v67_v31 = vrot.slane %v51_v27, 7  ;;  %v2085_v32 = vld [vmem:[%s2660_s3 + $0x50] sm:$0xff]  }
  0x25   :  { %v60_v29 = vrot.slane %v59_v25, 4  ;;  %v61_v30 = vrot.slane %v49_v26, 7  ;;  %75 = vst [vmem:[#allocation2] sm:$0xe] %v59_v25  ;;  %v50_v33 = vld [vmem:[%s2658_s1 + $0x8] sm:$0xf] }
  0x26   :  { %401 = vmatpush1.bf16.msra.mxu1 %v2082_v21  ;;  %v2086_v34 = vld [vmem:[%s2660_s3 + $0xb8] sm:$0xff]   ;;  %v64_v37 = vrot.slane %v50_v33, 7  ;;  %v69_v38 = vrot.slane %v67_v31, 4  ;;  %vm44_vm7 = vcmask 1041409   ;;  %vm45_vm8 = vcmask 521221   ;;  %v2087_v41 = vld [vmem:[%s2660_s3 + $0x48] sm:$0xff]  }
  0x27   :  { %402 = vmatprep.subr.bf16.mxu1 %v2161_v5  ;;  %547 = vmatpush2.bf16.msra.mxu0 %v2083_v22  ;;  %v62_v35 = vsel %vm2325_vm5, %v60_v29, %v61_v30  ;;  %v63_v36 = vrot.slane %v61_v30, 4  ;;  %vm46_vm9 = vmor %vm45_vm8, %vm44_vm7  ;;  %v2088_v42 = vld [vmem:[%s2660_s3 + $0xb0] sm:$0xff]   ;;  %v2089_v44 = vld [vmem:[%s2660_s3 + $0x40] sm:$0xff]   ;;  %vm212_vm10 = vcmask 519169   ;;  %vm214_vm11 = vcmask 519168  }
  0x28   :  { %548 = vmatprep.subr.bf16.mxu0 %v2161_v5  ;;  %76 = vst [vmem:[#allocation2 + $0x8] sm:$0xf] %v62_v35  ;;  %v66_v40 = vrot.slane %v64_v37, 4  ;;  %79 = vst [vmem:[#allocation2 + $0x20] sm:$0x1] %v69_v38  ;;  %v2090_v45 = vld [vmem:[%s2660_s3 + $0xa8] sm:$0xff]  }
  0x29   :  { %v65_v39 = vsel %vm2325_vm5, %v63_v36, %v64_v37  ;;  %47 = vst.msk [vmem:[#allocation2 + $0x20] sm:$0x22] %vm46_vm9, %v2161_v5  ;;  %v2093_v46 = vld [vmem:[%s2660_s3 + $0xa0] sm:$0xff]   ;;  %vm381_vm12 = vcmask 523264   ;;  %vm296_vm13 = vcmask 1046528   ;;  %v2099_v18 = vld [vmem:[%s2660_s3 + $0xf8] sm:$0xff]  }
  0x2a   :  { %403 = vmatpush1.bf16.msra.mxu1 %v2084_v24  ;;  %77 = vst [vmem:[#allocation2 + $0x10] sm:$0xf] %v65_v39  ;;  %v68_v43 = vsel %vm2325_vm5, %v66_v40, %v67_v31  ;;  %v2101_v23 = vld [vmem:[%s2660_s3 + $0xf0] sm:$0xff]   ;;  %v2103_v30 = vld [vmem:[%s2660_s3 + $0xe8] sm:$0xff]   ;;  %vm608_vm14 = vcmask 1045504   ;;  %v2107_v35 = vld [vmem:[%s2660_s3 + $0xd8] sm:$0xff]  }
  0x2b   :  { %412 = vmatprep.subr.bf16.mxu1 %v2161_v5  ;;  %549 = vmatpush2.bf16.msra.mxu0 %v2085_v32  ;;  %78 = vst [vmem:[#allocation2 + $0x18] sm:$0xf] %v68_v43  ;;  %v2108_v36 = vld [vmem:[%s2660_s3 + $0xd0] sm:$0xff]   ;;  %v2109_v37 = vld [vmem:[%s2660_s3 + $0xc8] sm:$0xff]   ;;  %v2110_v38 = vld [vmem:[%s2660_s3 + $0xc0] sm:$0xff]  }
  0x2c   :  { %550 = vmatprep.subr.bf16.mxu0 %v2161_v5  ;;  %v2111_v39 = vld [vmem:[%s2660_s3 + $0x118] sm:$0xff]   ;;  %v2112_v40 = vld [vmem:[%s2660_s3 + $0x110] sm:$0xff]  }
  0x2e   :  { %413 = vmatpush2.bf16.msra.mxu1 %v2086_v34  ;;  %v2106_v34 = vld [vmem:[%s2660_s3 + $0xe0] sm:$0xff]  }
  0x2f   :  { %414 = vmatprep.subr.bf16.mxu1 %v2161_v5  ;;  %551 = vmatpush2.bf16.msra.mxu0 %v2087_v41  ;;  %v2113_v41 = vld [vmem:[%s2660_s3 + $0x108] sm:$0xff]  }
  0x30   :  { %552 = vmatprep.subr.bf16.mxu0 %v2161_v5 }
  0x32   :  { %415 = vmatpush2.bf16.msra.mxu1 %v2088_v42  ;;  %v2388_v11 = vld [vmem:[#allocation2 + $0x10] ss:$8 sps:$4 sm:$0xff]  }
  0x33   :  { %416 = vmatprep.subr.bf16.mxu1 %v2161_v5  ;;  %553 = vmatpush2.bf16.msra.mxu0 %v2089_v44  ;;  %v298_v17 = vrot.slane %v2388_v11, 1  ;;  %v2114_v44 = vld [vmem:[%s2660_s3 + $0x100] sm:$0xff]  }
  0x36   :  { %417 = vmatpush2.bf16.msra.mxu1 %v2090_v45 }
  0x37   :  { %418 = vmatprep.subr.bf16.mxu1 %v2161_v5 }
  0x3a   :  { %419 = vmatpush2.bf16.msra.mxu1 %v2093_v46  ;;  %v610_v46 = vrot.slane %v2388_v11, 2 }
  0x3b   :  { %699 = vmatprep.subr.bf16.mxu1 %v2161_v5 }
  0xc6   :  { %v1904_v47 = vpop.f32.mrf.mxu0 }
  0xc7   :  { %v1803_v48 = vpack.c.bf16 %v1904_v47, %v1904_v47 }
  0xc8   :  { %v165_v49 = vpop.f32.mrf.mxu0 }
  0xc9   :  { %v1802_v50 = vpack.c.bf16 %v165_v49, %v165_v49  ;;  %v198_v52 = vrot.slane %v1803_v48, 7 }
  0xca   :  { %v1907_v51 = vpop.f32.mrf.mxu0 }
  0xcb   :  { %v196_v53 = vrot.slane %v1802_v50, 7  ;;  %v1805_v54 = vpack.c.bf16 %v1907_v51, %v1907_v51  ;;  %v200_v59 = vrot.slane %v198_v52, 4 }
  0xcc   :  { %v175_v55 = vpop.f32.mrf.mxu0 }
  0xcd   :  { %v197_v56 = vrot.slane %v196_v53, 4  ;;  %213 = vst.msk [vmem:[#allocation2 + $0x4] sm:$0xe] %vm212_vm10, %v196_v53  ;;  %v204_v57 = vrot.slane %v1805_v54, 7  ;;  %v1804_v58 = vpack.c.bf16 %v175_v55, %v175_v55  ;;  %v758_v54 = vld [vmem:[%s2662_s5 + $0x30] sm:$0xff]  ;;  %v757_v55 = vld [vmem:[%s2662_s5 + $0x28] sm:$0xff] }
  0xcf   :  { %v199_v60 = vsel %vm2325_vm5, %v197_v56, %v198_v52  ;;  %v206_v61 = vrot.slane %v204_v57, 4  ;;  %v201_v62 = vrot.slane %v1804_v58, 7  ;;  %v756_v56 = vld [vmem:[%s2662_s5 + $0x20] sm:$0xff]  ;;  %v754_v58 = vld [vmem:[%s2662_s5 + $0x10] sm:$0xff] }
  0xd0   :  { %215 = vst.msk [vmem:[#allocation2 + $0xc] sm:$0xf] %vm214_vm11, %v199_v60  ;;  %v752_v60 = vld [vmem:[%s2662_s5] sm:$0xff] }
  0xd1   :  { %219 = vst.msk [vmem:[#allocation2 + $0x24] sm:$0x1] %vm218_vm6, %v206_v61  ;;  %v202_v63 = vsel %vm2325_vm5, %v200_v59, %v201_v62  ;;  %v203_v0 = vrot.slane %v201_v62, 4  ;;  %v753_v59 = vld [vmem:[%s2662_s5 + $0x8] sm:$0xff] }
  0xd2   :  { %216 = vst.msk [vmem:[#allocation2 + $0x14] sm:$0xf] %vm214_vm11, %v202_v63 }
  0xd3   :  { %v205_v1 = vsel %vm2325_vm5, %v203_v0, %v204_v57  ;;  %v755_v57 = vld [vmem:[%s2662_s5 + $0x18] sm:$0xff] }
  0xd4   :  { %217 = vst.msk [vmem:[#allocation2 + $0x1c] sm:$0xf] %vm214_vm11, %v205_v1  ;;  %v220_v2 = vld [vmem:[#allocation2] sm:$0xff] }
  0xd5   :  { %v248_v7 = vld [vmem:[#allocation2] sm:$0xee] }
  0xd6   :  { %v571_v25 = vld [vmem:[#allocation2] sm:$0xcc] }
  0xd7   :  { %v2381_v3 = vld [vmem:[#allocation2 + $0x8] sm:$0xff] }
  0xd8   :  { %v1690_v4 = vcombine.low %v220_v2, %v2381_v3  ;;  %v1691_v6 = vcombine.high %v220_v2, %v2381_v3  ;;  %v249_v8 = vld [vmem:[#allocation2 + $0x20] sm:$0x11]  ;;  %v1671_v9 = vcombine.high %v248_v7, %v2381_v3  ;;  %v1670_v10 = vcombine.low %v248_v7, %v2381_v3 }
  0xd9   :  { %v1675_v13 = vcombine.high %v249_v8, %v249_v8  ;;  %v1674_v24 = vcombine.low %v249_v8, %v249_v8  ;;  %v1731_v26 = vcombine.high %v571_v25, %v2381_v3  ;;  %v572_v42 = vld [vmem:[#allocation2 + $0x20] sm:$0x33]  ;;  %v1730_v43 = vcombine.low %v571_v25, %v2381_v3 }
  0xda   :  { %1704 = vmatprep.mubr.msk.bf16.mxu0 %vm381_vm12, %v1691_v6  ;;  %v300_v14 = vrot.slane %v1671_v9, 1  ;;  %v297_v16 = vrot.slane %v1670_v10, 1  ;;  %v1733_v45 = vcombine.high %v572_v42, %v572_v42  ;;  %v1732_v51 = vcombine.low %v572_v42, %v572_v42 }
  0xdb   :  { %555 = vmatmul.mubr.bf16.vlgmr.msra.gmra.mxu0 %v1690_v4  ;;  %v2390_v12 = vld [vmem:[#allocation2 + $0x14] ss:$8 sps:$4 sm:$0xff]   ;;  %v305_v21 = vrot.slane %v1675_v13, 1  ;;  %v303_v29 = vrot.slane %v1674_v24, 1  ;;  %v612_v31 = vrot.slane %v1731_v26, 2  ;;  %v609_v47 = vrot.slane %v1730_v43, 2 }
  0xdc   :  { %1705 = vmatprep.mubr.msk.bf16.mxu0 %vm381_vm12, %v2390_v12  ;;  %v301_v15 = vrot.slane %v2390_v12, 1  ;;  %v299_v20 = vsel %vm296_vm13, %v297_v16, %v298_v17  ;;  %v613_v27 = vrot.slane %v2390_v12, 2  ;;  %v617_v48 = vrot.slane %v1733_v45, 2 }
  0xdd   :  { %v304_v32 = vsel %vm296_vm13, %v298_v17, %v303_v29  ;;  %v611_v49 = vsel %vm608_vm14, %v609_v47, %v610_v46  ;;  %v615_v52 = vrot.slane %v1732_v51, 2 }
  0xde   :  { %v302_v19 = vsel %vm296_vm13, %v300_v14, %v301_v15  ;;  %v306_v22 = vsel %vm296_vm13, %v301_v15, %v305_v21  ;;  %v614_v33 = vsel %vm608_vm14, %v612_v31, %v613_v27  ;;  %v618_v50 = vsel %vm608_vm14, %v613_v27, %v617_v48 }
  0xdf   :  { %1688 = vmatprep.mubr.msk.bf16.mxu1 %vm381_vm12, %v302_v19  ;;  %v616_v53 = vsel %vm608_vm14, %v610_v46, %v615_v52 }
  0xe0   :  { %421 = vmatmul.mubr.bf16.vlgmr.msra.gmra.mxu1 %v299_v20 }
  0xe1   :  { %700 = vmatpush1.bf16.msra.mxu1 %v2099_v18  ;;  %1689 = vmatprep.mubr.msk.bf16.mxu1 %vm381_vm12, %v306_v22 }
  0xe2   :  { %701 = vmatprep.subr.bf16.mxu1 %v2161_v5 }
  0xe3   :  { %563 = vmatmul.mubr.bf16.gmra.mxu0 %v2388_v11 }
  0xe5   :  { %702 = vmatpush1.bf16.msra.mxu1 %v2101_v23 }
  0xe6   :  { %703 = vmatprep.subr.bf16.mxu1 %v2161_v5 }
  0xe8   :  { %429 = vmatmul.mubr.bf16.gmra.mxu1 %v304_v32 }
  0xe9   :  { %704 = vmatpush1.bf16.msra.mxu1 %v2103_v30  ;;  %1746 = vmatprep.mubr.msk.bf16.mxu1 %vm381_vm12, %v614_v33 }
  0xea   :  { %705 = vmatprep.subr.bf16.mxu1 %v2161_v5 }
  0xed   :  { %706 = vmatpush1.bf16.msra.mxu1 %v2106_v34 }
  0xee   :  { %707 = vmatprep.subr.bf16.mxu1 %v2161_v5 }
  0xf1   :  { %708 = vmatpush1.bf16.msra.mxu1 %v2107_v35 }
  0xf2   :  { %709 = vmatprep.subr.bf16.mxu1 %v2161_v5 }
  0xf5   :  { %710 = vmatpush1.bf16.msra.mxu1 %v2108_v36 }
  0xf6   :  { %711 = vmatprep.subr.bf16.mxu1 %v2161_v5 }
  0xf9   :  { %712 = vmatpush1.bf16.msra.mxu1 %v2109_v37 }
  0xfa   :  { %713 = vmatprep.subr.bf16.mxu1 %v2161_v5 }
  0xfd   :  { %714 = vmatpush1.bf16.msra.mxu1 %v2110_v38 }
  0xfe   :  { %723 = vmatprep.subr.bf16.mxu1 %v2161_v5 }
 0x101   :  { %724 = vmatpush2.bf16.msra.mxu1 %v2111_v39 }
 0x102   :  { %725 = vmatprep.subr.bf16.mxu1 %v2161_v5 }
 0x105   :  { %726 = vmatpush2.bf16.msra.mxu1 %v2112_v40 }
 0x106   :  { %727 = vmatprep.subr.bf16.mxu1 %v2161_v5 }
 0x109   :  { %728 = vmatpush2.bf16.msra.mxu1 %v2113_v41 }
 0x10a   :  { %729 = vmatprep.subr.bf16.mxu1 %v2161_v5  ;;  %v759_v5 = vld [vmem:[%s2662_s5 + $0x38] sm:$0xff] }
 0x10b   :  { %1908 = vmatprep.subr.mxu0 %v759_v5 }
 0x10c   :  { %1909 = vmatpush3.msra.mxu0 %v759_v5 }
 0x10d   :  { %730 = vmatpush2.bf16.msra.mxu1 %v2114_v44  ;;  %1910 = vmatprep.subr.mxu0 %v758_v54 }
 0x10e   :  { %1911 = vmatpush3.msra.mxu0 %v758_v54 }
 0x10f   :  { %1912 = vmatprep.subr.mxu0 %v757_v55 }
 0x110   :  { %732 = vmatmul.mubr.bf16.vlgmr.msra.gmra.mxu1 %v611_v49  ;;  %1913 = vmatpush3.msra.mxu0 %v757_v55 }
 0x111   :  { %1747 = vmatprep.mubr.msk.bf16.mxu1 %vm381_vm12, %v618_v50  ;;  %1914 = vmatprep.subr.mxu0 %v756_v56 }
 0x112   :  { %1915 = vmatpush3.msra.mxu0 %v756_v56 }
 0x113   :  { %1916 = vmatprep.subr.mxu0 %v755_v57 }
 0x114   :  { %1917 = vmatpush3.msra.mxu0 %v755_v57 }
 0x115   :  { %1918 = vmatprep.subr.mxu0 %v754_v58 }
 0x116   :  { %1919 = vmatpush3.msra.mxu0 %v754_v58 }
 0x117   :  { %1920 = vmatprep.subr.mxu0 %v753_v59 }
 0x118   :  { %740 = vmatmul.mubr.bf16.gmra.mxu1 %v616_v53  ;;  %1921 = vmatpush3.msra.mxu0 %v753_v59 }
 0x119   :  { %1922 = vmatprep.subr.mxu0 %v752_v60 }
 0x11a   :  { %1923 = vmatpush3.msra.mxu0 %v752_v60 }
 0x11b   :  { %1930 = vmatprep.subr.mxu0 %v759_v5 }
 0x19b   :  { %v556_v61 = vpop.f32.mrf.mxu0 }
 0x19d   :  { %v558_v62 = vpop.f32.mrf.mxu0 }
 0x19e   :  { %v2123_v62 = vld [vmem:[%s2661_s4] sm:$0xff]  }
 0x19f   :  { %v559_v63 = vpop.f32.mrf.mxu0 }
 0x1a0   :  { %v422_v1 = vpop.f32.mrf.mxu1 }
 0x1a1   :  { %v561_v0 = vpop.f32.mrf.mxu0  ;;  %v557_v14 = vadd.f32 %v556_v61, %v422_v1  ;;  %v2122_v61 = vld [vmem:[%s2661_s4 + $0x28] sm:$0xff]   ;;  %v2545_v1 = vld [vmem:[%s2663_s6 + $0x78] sm:$0xff] }
 0x1a2   :  { %v424_v3 = vpop.f32.mrf.mxu1  ;;  %v2539_v0 = vld [vmem:[%s2661_s4 + $0x58] sm:$0xff]  }
 0x1a3   :  { %v564_v2 = vpop.f32.mrf.mxu0 }
 0x1a4   :  { %v425_v6 = vpop.f32.mrf.mxu1 }
 0x1a5   :  { %v566_v4 = vpop.f32.mrf.mxu0  ;;  %v560_v18 = vadd.f32 %v559_v63, %v425_v6  ;;  %v2124_v63 = vld [vmem:[%s2661_s4 + $0x20] sm:$0xff]  }
 0x1a6   :  { %v427_v8 = vpop.f32.mrf.mxu1 }
 0x1a7   :  { %v567_v7 = vpop.f32.mrf.mxu0 }
 0x1a8   :  { %v430_v10 = vpop.f32.mrf.mxu1 }
 0x1a9   :  { %v569_v9 = vpop.f32.mrf.mxu0  ;;  %v565_v22 = vadd.f32 %v564_v2, %v430_v10 }
 0x1aa   :  { %v432_v11 = vpop.f32.mrf.mxu1 }
 0x1ac   :  { %v433_v12 = vpop.f32.mrf.mxu1 }
 0x1ad   :  { %v568_v26 = vadd.f32 %v567_v7, %v433_v12 }
 0x1ae   :  { %v435_v13 = vpop.f32.mrf.mxu1 }
 0x1d0   :  { %v733_v15 = vpop.f32.mrf.mxu1 }
 0x1d1   :  { %v748_v16 = vadd.f32 %v733_v15, %v557_v14 }
 0x1d2   :  { %v735_v17 = vpop.f32.mrf.mxu1 }
 0x1d3   :  { %1924 = vmatprep.mubr.msk.f32.mxu0 %vm381_vm12, %v748_v16 }
 0x1d4   :  { %v736_v19 = vpop.f32.mrf.mxu1 }
 0x1d5   :  { %v749_v20 = vadd.f32 %v736_v19, %v560_v18 }
 0x1d6   :  { %v738_v21 = vpop.f32.mrf.mxu1 }
 0x1d7   :  { %1925 = vmatmul.mubr.msk.f32.vlgmr.msra.gmra.mxu0 %vm381_vm12, %v749_v20 }
 0x1d8   :  { %v741_v23 = vpop.f32.mrf.mxu1  ;;  %1931 = vmatpush3.msra.mxu0 %v759_v5 }
 0x1d9   :  { %v750_v24 = vadd.f32 %v741_v23, %v565_v22  ;;  %1932 = vmatprep.subr.mxu0 %v758_v54  ;;  %v995_v22 = vlaneseq }
 0x1da   :  { %v743_v25 = vpop.f32.mrf.mxu1  ;;  %1933 = vmatpush3.msra.mxu0 %v758_v54 }
 0x1db   :  { %1927 = vmatprep.mubr.msk.f32.mxu0 %vm381_vm12, %v750_v24  ;;  %1934 = vmatprep.subr.mxu0 %v757_v55  ;;  %v2552_v23 = vshrl.u32 %v995_v22, 7 }
 0x1dc   :  { %v744_v27 = vpop.f32.mrf.mxu1  ;;  %1935 = vmatpush3.msra.mxu0 %v757_v55 }
 0x1dd   :  { %v751_v29 = vadd.f32 %v744_v27, %v568_v26  ;;  %1936 = vmatprep.subr.mxu0 %v756_v56  ;;  %v997_v25 = vsub.s32 0, %v2552_v23 }
 0x1de   :  { %v746_v30 = vpop.f32.mrf.mxu1  ;;  %1937 = vmatpush3.msra.mxu0 %v756_v56  ;;  %v2117_v56 = vld [vmem:[%s2661_s4 + $0x18] sm:$0xff]  }
 0x1df   :  { %1928 = vmatmul.mubr.msk.f32.gmra.mxu0 %vm381_vm12, %v751_v29  ;;  %1938 = vmatprep.subr.mxu0 %v755_v57  ;;  %v1756_v30 = vld [vmem:[%s2665_s8] ss:$0 sm:$0xff] }
 0x1e0   :  { %1939 = vmatpush3.msra.mxu0 %v755_v57  ;;  %1964 = vmatprep.subr.bf16.mxu1 %v2117_v56  ;;  %v2118_v57 = vld [vmem:[%s2661_s4 + $0x38] sm:$0xff]  }
 0x1e1   :  { %1940 = vmatprep.subr.mxu0 %v754_v58  ;;  %1965 = vmatpush3.bf16.msra.mxu1 %v2117_v56 }
 0x1e2   :  { %1941 = vmatpush3.msra.mxu0 %v754_v58  ;;  %v2119_v58 = vld [vmem:[%s2661_s4 + $0x10] sm:$0xff]  }
 0x1e3   :  { %1942 = vmatprep.subr.mxu0 %v753_v59  ;;  %1966 = vmatprep.subr.bf16.mxu1 %v2119_v58 }
 0x1e4   :  { %1943 = vmatpush3.msra.mxu0 %v753_v59  ;;  %v2120_v59 = vld [vmem:[%s2661_s4 + $0x30] sm:$0xff]  }
 0x1e5   :  { %1944 = vmatprep.subr.mxu0 %v752_v60  ;;  %1967 = vmatpush3.bf16.msra.mxu1 %v2119_v58 }
 0x1e6   :  { %1945 = vmatpush3.msra.mxu0 %v752_v60  ;;  %v2121_v60 = vld [vmem:[%s2661_s4 + $0x8] sm:$0xff]  }
 0x1e7   :  { %1952 = vmatprep.subr.bf16.mxu0 %v2118_v57  ;;  %1968 = vmatprep.subr.bf16.mxu1 %v2121_v60 }
 0x1e9   :  { %1969 = vmatpush3.bf16.msra.mxu1 %v2121_v60 }
 0x1ea   :  { %1970 = vmatprep.subr.bf16.mxu1 %v2123_v62 }
 0x1ed   :  { %1971 = vmatpush3.bf16.msra.mxu1 %v2123_v62 }
 0x1ee   :  { %1988 = vmatprep.subr.mxu1 %v2545_v1 }
 0x297   :  { %v1926_v31 = vpop.f32.mrf.mxu0 }
 0x298   :  { %v858_v35 = vsel %vm381_vm12, %v1926_v31, 0.0 }
 0x299   :  { %v838_v32 = vpop.f32.mrf.mxu0 }
 0x29a   :  { %v857_v33 = vsel %vm381_vm12, %v838_v32, 0.0 }
 0x29b   :  { %v859_v36 = vadd.f32 %v858_v35, %v857_v33 }
 0x29f   :  { %v1929_v34 = vpop.f32.mrf.mxu0 }
 0x2a0   :  { %v862_v40 = vsel %vm381_vm12, %v1929_v34, 0.0 }
 0x2a1   :  { %v848_v37 = vpop.f32.mrf.mxu0 }
 0x2a2   :  { %v860_v38 = vsel %vm381_vm12, %v848_v37, 0.0 }
 0x2a3   :  { %v861_v39 = vadd.f32 %v860_v38, %v859_v36 }
 0x2a5   :  { %v863_v41 = vadd.f32 %v862_v40, %v861_v39 }
 0x2a7   :  { %v864_v42 = vrot.slane %v863_v41, 4 }
 0x2a9   :  { %v865_v43 = vadd.f32 %v864_v42, %v863_v41 }
 0x2ab   :  { %v866_v44 = vrot.slane %v865_v43, 2 }
 0x2ad   :  { %v867_v45 = vadd.f32 %v866_v44, %v865_v43 }
 0x2af   :  { %v868_v46 = vrot.slane %v867_v45, 1 }
 0x2b1   :  { %v869_v47 = vadd.f32 %v868_v46, %v867_v45 }
 0x2b3   :  { %v871_v48 = vmul.f32 0.03125, %v869_v47 }
 0x2b5   :  { %v2492_v49 = vsub.f32 %v749_v20, %v871_v48  ;;  %v2494_v50 = vsub.f32 %v748_v16, %v871_v48  ;;  %v2496_v51 = vsub.f32 %v750_v24, %v871_v48  ;;  %v2502_v5 = vsub.f32 %v751_v29, %v871_v48  ;;  %v993_v24 = vld [vmem:[%s2664_s7] sm:$0x1] }
 0x2b7   :  { %v876_v52 = vmul.f32 %v2494_v50, %v2494_v50  ;;  %v877_v53 = vmul.f32 %v2492_v49, %v2492_v49  ;;  %v878_v54 = vmul.f32 %v2496_v51, %v2496_v51  ;;  %v879_v55 = vmul.f32 %v2502_v5, %v2502_v5 }
 0x2b9   :  { %1946 = vmatprep.mubr.msk.f32.mxu0 %vm381_vm12, %v876_v52 }
 0x2ba   :  { %1947 = vmatmul.mubr.msk.f32.vlgmr.msra.gmra.mxu0 %vm381_vm12, %v877_v53 }
 0x2bb   :  { %1949 = vmatprep.mubr.msk.f32.mxu0 %vm381_vm12, %v878_v54  ;;  %1953 = vmatpush3.bf16.msra.mxu0 %v2118_v57 }
 0x2bc   :  { %1954 = vmatprep.subr.bf16.mxu0 %v2120_v59 }
 0x2be   :  { %1950 = vmatmul.mubr.msk.f32.gmra.mxu0 %vm381_vm12, %v879_v55 }
 0x2bf   :  { %1955 = vmatpush3.bf16.msra.mxu0 %v2120_v59 }
 0x2c0   :  { %1956 = vmatprep.subr.bf16.mxu0 %v2122_v61 }
 0x2c3   :  { %1957 = vmatpush3.bf16.msra.mxu0 %v2122_v61 }
 0x2c4   :  { %1958 = vmatprep.subr.bf16.mxu0 %v2124_v63 }
 0x2c7   :  { %1959 = vmatpush3.bf16.msra.mxu0 %v2124_v63 }
 0x2c8   :  { %1976 = vmatprep.subr.bf16.mxu0 %v2539_v0 }
 0x37a   :  { %v1948_v2 = vpop.f32.mrf.mxu0 }
 0x37b   :  { %v978_v7 = vsel %vm381_vm12, %v1948_v2, 0.0 }
 0x37c   :  { %v958_v3 = vpop.f32.mrf.mxu0 }
 0x37d   :  { %v977_v4 = vsel %vm381_vm12, %v958_v3, 0.0 }
 0x37e   :  { %v1951_v6 = vpop.f32.mrf.mxu0  ;;  %v979_v8 = vadd.f32 %v978_v7, %v977_v4 }
 0x37f   :  { %v982_v12 = vsel %vm381_vm12, %v1951_v6, 0.0 }
 0x380   :  { %v968_v9 = vpop.f32.mrf.mxu0 }
 0x381   :  { %v980_v10 = vsel %vm381_vm12, %v968_v9, 0.0 }
 0x382   :  { %v981_v11 = vadd.f32 %v980_v10, %v979_v8 }
 0x384   :  { %v983_v13 = vadd.f32 %v982_v12, %v981_v11  ;;  %v1383_v12 = vld [vmem:[%s2663_s6 + $0x70] sm:$0xff] }
 0x386   :  { %v984_v14 = vrot.slane %v983_v13, 4 }
 0x388   :  { %v985_v15 = vadd.f32 %v984_v14, %v983_v13 }
 0x38a   :  { %v986_v16 = vrot.slane %v985_v15, 2 }
 0x38c   :  { %v987_v17 = vadd.f32 %v986_v16, %v985_v15  ;;  %v2131_v15 = vld [vmem:[%s2661_s4 + $0x50] sm:$0xff]  }
 0x38e   :  { %v988_v18 = vrot.slane %v987_v17, 1 }
 0x390   :  { %v989_v19 = vadd.f32 %v988_v18, %v987_v17  ;;  %v1382_v17 = vld [vmem:[%s2663_s6 + $0x68] sm:$0xff] }
 0x392   :  { %v990_v20 = vmul.f32 0.03125, %v989_v19  ;;  %v2132_v19 = vld [vmem:[%s2661_s4 + $0x48] sm:$0xff]  }
 0x394   :  { %v991_v21 = vadd.f32 1e-05, %v990_v20  ;;  %v2133_v20 = vld [vmem:[%s2661_s4 + $0x40] sm:$0xff]   ;;  %s2162_s4 = smov [#allocation4]  }
 0x395   :  { %s1627_s24 = sshll.u32 %s2162_s4, 4  ;;  %s1628_s24 = int_to_ptr.vmem [resolvable:$true] %s1627_s24 }
 0x396   :  { %2135 = vrsqrt.f32 %v991_v21  ;;  %p2144_p1 = scmp.lt.s32.totalorder %s1628_s24, %s1628_s24 }
 0x3a3   :  { %v2136_v26 = vpop.eup %2135 }
 0x3a4   :  { %v994_v27 = vmul.f32 %v2136_v26, %v993_v24  ;;  %v1381_v24 = vld [vmem:[%s2663_s6 + $0x60] sm:$0xff]  ;;  %v1380_v26 = vld [vmem:[%s2663_s6 + $0x58] sm:$0xff] }
 0x3a6   :  { %v998_v29 = vrot.slane %v994_v27, %v997_v25  ;;  %v1378_v27 = vld [vmem:[%s2663_s6 + $0x48] sm:$0xff] }
 0x3a8   :  { %v999_v31 = vmul.f32 %v998_v29, %v2494_v50  ;;  %v1000_v32 = vmul.f32 %v998_v29, %v2492_v49  ;;  %v1001_v33 = vmul.f32 %v998_v29, %v2496_v51  ;;  %v1002_v34 = vmul.f32 %v998_v29, %v2502_v5  ;;  %v1377_v29 = vld [vmem:[%s2663_s6 + $0x40] sm:$0xff] }
 0x3aa   :  { %v1010_v35 = vadd.f32 %v1756_v30, %v999_v31  ;;  %v1011_v36 = vadd.f32 %v1756_v30, %v1000_v32  ;;  %v1012_v37 = vadd.f32 %v1756_v30, %v1001_v33  ;;  %v1013_v38 = vadd.f32 %v1756_v30, %v1002_v34  ;;  %v1376_v30 = vld [vmem:[%s2663_s6 + $0x38] sm:$0xff]  ;;  %v1375_v31 = vld [vmem:[%s2663_s6 + $0x30] sm:$0xff]  ;;  %v1374_v32 = vld [vmem:[%s2663_s6 + $0x28] sm:$0xff] }
 0x3ab   :  { %v1373_v33 = vld [vmem:[%s2663_s6 + $0x20] sm:$0xff]  ;;  %v1372_v34 = vld [vmem:[%s2663_s6 + $0x18] sm:$0xff] }
 0x3ac   :  { %vm1014_vm15 = vcmp.gt.f32.partialorder %v1010_v35, 0.0  ;;  %vm1015_vm0 = vcmp.gt.f32.partialorder %v1011_v36, 0.0  ;;  %vm1016_vm1 = vcmp.gt.f32.partialorder %v1012_v37, 0.0  ;;  %vm1017_vm2 = vcmp.gt.f32.partialorder %v1013_v38, 0.0 }
 0x3ad   :  { %v1018_v39 = vmul.f32 0.01, %v1010_v35  ;;  %v1019_v40 = vmul.f32 0.01, %v1011_v36  ;;  %v1020_v41 = vmul.f32 0.01, %v1012_v37 }
 0x3ae   :  { %v1021_v42 = vmul.f32 0.01, %v1013_v38 }
 0x3af   :  { %v1022_v43 = vsel %vm1014_vm15, %v1010_v35, %v1018_v39  ;;  %v1023_v44 = vsel %vm1015_vm0, %v1011_v36, %v1019_v40  ;;  %v1024_v45 = vsel %vm1016_vm1, %v1012_v37, %v1020_v41  ;;  %v1371_v35 = vld [vmem:[%s2663_s6 + $0x10] sm:$0xff]  ;;  %v1370_v36 = vld [vmem:[%s2663_s6 + $0x8] sm:$0xff]  ;;  %v1369_v37 = vld [vmem:[%s2663_s6] sm:$0xff] }
 0x3b0   :  { %v1025_v46 = vsel %vm1017_vm2, %v1013_v38, %v1021_v42  ;;  %v1806_v47 = vpack.c.bf16 %v1022_v43, %v1022_v43  ;;  %v1807_v48 = vpack.c.bf16 %v1023_v44, %v1023_v44  ;;  %v1808_v49 = vpack.c.bf16 %v1024_v45, %v1024_v45 }
 0x3b1   :  { %v1809_v50 = vpack.c.bf16 %v1025_v46, %v1025_v46 }
 0x3b2   :  { %v1041_v51 = vrot.slane %v1806_v47, 7  ;;  %v1043_v52 = vrot.slane %v1807_v48, 7  ;;  %v1046_v53 = vrot.slane %v1808_v49, 7 }
 0x3b3   :  { %v1049_v5 = vrot.slane %v1809_v50, 7 }
 0x3b4   :  { %v1042_v54 = vrot.slane %v1041_v51, 4  ;;  %v1045_v55 = vrot.slane %v1043_v52, 4  ;;  %v1048_v56 = vrot.slane %v1046_v53, 4  ;;  %1057 = vst.msk [vmem:[#allocation3] sm:$0xe] %vm212_vm10, %v1041_v51 }
 0x3b5   :  { %v1051_v57 = vrot.slane %v1049_v5, 4 }
 0x3b6   :  { %v1047_v58 = vsel %vm2325_vm5, %v1045_v55, %v1046_v53  ;;  %v1050_v59 = vsel %vm2325_vm5, %v1048_v56, %v1049_v5  ;;  %v1044_v60 = vsel %vm2325_vm5, %v1042_v54, %v1043_v52 }
 0x3b7   :  { %1059 = vst.msk [vmem:[#allocation3 + $0x8] sm:$0xf] %vm214_vm11, %v1047_v58  ;;  %1060 = vst.msk [vmem:[#allocation3 + $0xc] sm:$0xf] %vm214_vm11, %v1050_v59 }
 0x3b8   :  { %1061 = vst.msk [vmem:[#allocation3 + $0x10] sm:$0x1] %vm218_vm6, %v1051_v57 }
 0x3b9   :  { %1058 = vst.msk [vmem:[#allocation3 + $0x4] sm:$0xf] %vm214_vm11, %v1044_v60 }
 0x3bb   :  { %v1062_v61 = vld [vmem:[#allocation3] sm:$0xf] }
 0x3bc   :  { %v1074_v62 = vld [vmem:[#allocation3] sm:$0xe] }
 0x3bd   :  { %v1264_v63 = vld [vmem:[#allocation3] sm:$0xc] }
 0x3be   :  { %v2126_v4 = vld [vmem:[#allocation3 + $0x8] sm:$0xff]  }
 0x3bf   :  { %v2129_v7 = vld [vmem:[#allocation3 + $0x10] ss:$0 sps:$4 sm:$0x11]   ;;  %v1099_v9 = vrot.slane %v2126_v4, 1  ;;  %v1282_v13 = vrot.slane %v2126_v4, 2 }
 0x3c0   :  { %v1063_v2 = vld [vmem:[#allocation3 + $0x4] sm:$0xf]  ;;  %v1101_v10 = vrot.slane %v2129_v7, 1  ;;  %v2134_v21 = vld [vmem:[#allocation3 + $0x10] ss:$0 sps:$4 sm:$0x33]  }
 0x3c1   :  { %v1778_v3 = vcombine.low %v1062_v61, %v1063_v2  ;;  %v1769_v6 = vcombine.low %v1074_v62, %v1063_v2  ;;  %v1793_v8 = vcombine.low %v1264_v63, %v1063_v2  ;;  %v1284_v22 = vrot.slane %v2134_v21, 2 }
 0x3c2   :  { %v1102_v16 = vsel %vm296_vm13, %v1099_v9, %v1101_v10 }
 0x3c3   :  { %1972 = vmatprep.mubr.msk.bf16.mxu1 %vm381_vm12, %v1778_v3  ;;  %v1098_v28 = vrot.slane %v1769_v6, 1  ;;  %v1281_v11 = vrot.slane %v1793_v8, 2 }
 0x3c4   :  { %1973 = vmatmul.mubr.msk.bf16.vlgmr.msra.gmra.mxu1 %vm381_vm12, %v2126_v4 }
 0x3c5   :  { %v1100_v14 = vsel %vm296_vm13, %v1098_v28, %v1099_v9  ;;  %1989 = vmatpush3.msra.mxu1 %v2545_v1  ;;  %v1283_v18 = vsel %vm608_vm14, %v1281_v11, %v1282_v13 }
 0x3c6   :  { %1960 = vmatprep.mubr.msk.bf16.mxu0 %vm381_vm12, %v1100_v14  ;;  %1990 = vmatprep.subr.mxu1 %v1383_v12 }
 0x3c7   :  { %1961 = vmatmul.mubr.msk.bf16.vlgmr.msra.gmra.mxu0 %vm381_vm12, %v1102_v16  ;;  %1991 = vmatpush3.msra.mxu1 %v1383_v12 }
 0x3c8   :  { %1977 = vmatpush3.bf16.msra.mxu0 %v2539_v0  ;;  %1984 = vmatprep.mubr.msk.bf16.mxu0 %vm381_vm12, %v1283_v18  ;;  %v1285_v0 = vsel %vm608_vm14, %v1282_v13, %v1284_v22 }
 0x3c9   :  { %1978 = vmatprep.subr.bf16.mxu0 %v2131_v15  ;;  %1992 = vmatprep.subr.mxu1 %v1382_v17 }
 0x3ca   :  { %1993 = vmatpush3.msra.mxu1 %v1382_v17 }
 0x3cb   :  { %1994 = vmatprep.subr.mxu1 %v1381_v24 }
 0x3cc   :  { %1979 = vmatpush3.bf16.msra.mxu0 %v2131_v15  ;;  %1995 = vmatpush3.msra.mxu1 %v1381_v24 }
 0x3cd   :  { %1980 = vmatprep.subr.bf16.mxu0 %v2132_v19  ;;  %1996 = vmatprep.subr.mxu1 %v1380_v26 }
 0x3ce   :  { %1997 = vmatpush3.msra.mxu1 %v1380_v26 }
 0x3d0   :  { %1981 = vmatpush3.bf16.msra.mxu0 %v2132_v19 }
 0x3d1   :  { %1982 = vmatprep.subr.bf16.mxu0 %v2133_v20 }
 0x3d4   :  { %1983 = vmatpush3.bf16.msra.mxu0 %v2133_v20 }
 0x3d5   :  { %2026 = vmatprep.subr.mxu0 %v2545_v1 }
 0x3d7   :  { %1985 = vmatmul.mubr.msk.bf16.vlgmr.msra.gmra.mxu0 %vm381_vm12, %v1285_v0 }
 0x3d8   :  { %2027 = vmatpush3.msra.mxu0 %v2545_v1  ;;  %v1379_v1 = vld [vmem:[%s2663_s6 + $0x50] sm:$0xff] }
 0x3d9   :  { %2028 = vmatprep.subr.mxu0 %v1383_v12  ;;  %1998 = vmatprep.subr.mxu1 %v1379_v1 }
 0x3da   :  { %2029 = vmatpush3.msra.mxu0 %v1383_v12  ;;  %1999 = vmatpush3.msra.mxu1 %v1379_v1 }
 0x3db   :  { %2030 = vmatprep.subr.mxu0 %v1382_v17  ;;  %2000 = vmatprep.subr.mxu1 %v1378_v27 }
 0x3dc   :  { %2031 = vmatpush3.msra.mxu0 %v1382_v17  ;;  %2001 = vmatpush3.msra.mxu1 %v1378_v27 }
 0x3dd   :  { %2032 = vmatprep.subr.mxu0 %v1381_v24  ;;  %2002 = vmatprep.subr.mxu1 %v1377_v29 }
 0x3de   :  { %2033 = vmatpush3.msra.mxu0 %v1381_v24  ;;  %2003 = vmatpush3.msra.mxu1 %v1377_v29 }
 0x3df   :  { %2034 = vmatprep.subr.mxu0 %v1380_v26  ;;  %2004 = vmatprep.subr.mxu1 %v1376_v30 }
 0x3e0   :  { %2035 = vmatpush3.msra.mxu0 %v1380_v26  ;;  %2005 = vmatpush3.msra.mxu1 %v1376_v30 }
 0x3e1   :  { %2036 = vmatprep.subr.mxu0 %v1379_v1  ;;  %2006 = vmatprep.subr.mxu1 %v1375_v31 }
 0x3e2   :  { %2037 = vmatpush3.msra.mxu0 %v1379_v1  ;;  %2007 = vmatpush3.msra.mxu1 %v1375_v31 }
 0x3e3   :  { %2038 = vmatprep.subr.mxu0 %v1378_v27  ;;  %2008 = vmatprep.subr.mxu1 %v1374_v32 }
 0x3e4   :  { %2039 = vmatpush3.msra.mxu0 %v1378_v27  ;;  %2009 = vmatpush3.msra.mxu1 %v1374_v32 }
 0x3e5   :  { %2040 = vmatprep.subr.mxu0 %v1377_v29  ;;  %2010 = vmatprep.subr.mxu1 %v1373_v33 }
 0x3e6   :  { %2041 = vmatpush3.msra.mxu0 %v1377_v29  ;;  %2011 = vmatpush3.msra.mxu1 %v1373_v33 }
 0x3e7   :  { %2042 = vmatprep.subr.mxu0 %v1376_v30  ;;  %2012 = vmatprep.subr.mxu1 %v1372_v34 }
 0x3e8   :  { %2043 = vmatpush3.msra.mxu0 %v1376_v30  ;;  %2013 = vmatpush3.msra.mxu1 %v1372_v34 }
 0x3e9   :  { %2044 = vmatprep.subr.mxu0 %v1375_v31  ;;  %2014 = vmatprep.subr.mxu1 %v1371_v35 }
 0x3ea   :  { %2045 = vmatpush3.msra.mxu0 %v1375_v31  ;;  %2015 = vmatpush3.msra.mxu1 %v1371_v35 }
 0x3eb   :  { %2046 = vmatprep.subr.mxu0 %v1374_v32  ;;  %2016 = vmatprep.subr.mxu1 %v1370_v36 }
 0x3ec   :  { %2047 = vmatpush3.msra.mxu0 %v1374_v32  ;;  %2017 = vmatpush3.msra.mxu1 %v1370_v36 }
 0x3ed   :  { %2048 = vmatprep.subr.mxu0 %v1373_v33  ;;  %2018 = vmatprep.subr.mxu1 %v1369_v37 }
 0x3ee   :  { %2049 = vmatpush3.msra.mxu0 %v1373_v33  ;;  %2019 = vmatpush3.msra.mxu1 %v1369_v37  ;;  %v1585_v33 = vld [vmem:[%s2666_s9] sm:$0x1]  ;;  %s2139_s9 = scalar_lea.vmem %s1628_s24, 512 }
 0x3ef   :  { %2050 = vmatprep.subr.mxu0 %v1372_v34  ;;  %p2140_p0 = scmp.ne.s32.totalorder %s1628_s24, %s2139_s9  ;;  %p2145_p2 = scmp.lt.s32.totalorder %s2139_s9, %s2139_s9 }
 0x3f0   :  { %2051 = vmatpush3.msra.mxu0 %v1372_v34 }
 0x3f1   :  { %2052 = vmatprep.subr.mxu0 %v1371_v35  ;;  %p2146_p3 = por %p2145_p2, %p2144_p1 }
 0x3f2   :  { %2053 = vmatpush3.msra.mxu0 %v1371_v35 }
 0x3f3   :  { %2054 = vmatprep.subr.mxu0 %v1370_v36  ;;  %p2147_p4 = pnand %p2146_p3, %p2140_p0 }
 0x3f4   :  { %2055 = vmatpush3.msra.mxu0 %v1370_v36 }
 0x3f5   :  { %2056 = vmatprep.subr.mxu0 %v1369_v37 }
 0x3f6   :  { %2057 = vmatpush3.msra.mxu0 %v1369_v37  ;;  %v1801_v37 = vld [vmem:[%s2667_s10] ss:$0 sm:$0xff] }
 0x484   :  { %v1974_v40 = vpop.f32.mrf.mxu1 }
 0x486   :  { %v1249_v42 = vpop.f32.mrf.mxu1 }
 0x487   :  { %v1962_v38 = vpop.f32.mrf.mxu0 }
 0x488   :  { %v1975_v44 = vpop.f32.mrf.mxu1  ;;  %v1258_v52 = vadd.f32 %v1974_v40, %v1962_v38 }
 0x489   :  { %v1167_v39 = vpop.f32.mrf.mxu0 }
 0x48a   :  { %v1250_v46 = vadd.f32 %v1249_v42, %v1167_v39  ;;  %v1252_v49 = vpop.f32.mrf.mxu1 }
 0x48b   :  { %v1963_v41 = vpop.f32.mrf.mxu0 }
 0x48c   :  { %v1261_v55 = vadd.f32 %v1975_v44, %v1963_v41 }
 0x48d   :  { %v1170_v43 = vpop.f32.mrf.mxu0 }
 0x48e   :  { %v1253_v51 = vadd.f32 %v1252_v49, %v1170_v43 }
 0x497   :  { %v1986_v45 = vpop.f32.mrf.mxu0 }
 0x498   :  { %v1367_v54 = vadd.f32 %v1986_v45, %v1258_v52 }
 0x499   :  { %v1350_v47 = vpop.f32.mrf.mxu0 }
 0x49a   :  { %v1365_v48 = vadd.f32 %v1350_v47, %v1250_v46 }
 0x49b   :  { %v1987_v50 = vpop.f32.mrf.mxu0 }
 0x49c   :  { %2020 = vmatprep.mubr.f32.mxu1 %v1365_v48  ;;  %v1368_v56 = vadd.f32 %v1987_v50, %v1261_v55 }
 0x49d   :  { %v1353_v53 = vpop.f32.mrf.mxu0 }
 0x49e   :  { %v1366_v5 = vadd.f32 %v1353_v53, %v1253_v51 }
 0x4a0   :  { %2021 = vmatmul.mubr.f32.vlgmr.msra.gmra.mxu1 %v1366_v5 }
 0x4a1   :  { %2023 = vmatprep.mubr.f32.mxu1 %v1367_v54 }
 0x4a4   :  { %2024 = vmatmul.mubr.f32.gmra.mxu1 %v1368_v56 }
 0x560   :  { %v2022_v57 = vpop.f32.mrf.mxu1 }
 0x562   :  { %v1451_v58 = vpop.f32.mrf.mxu1 }
 0x563   :  { %v1470_v60 = vadd.f32 %v2022_v57, %v1451_v58 }
 0x564   :  { %v2025_v59 = vpop.f32.mrf.mxu1 }
 0x566   :  { %v1461_v61 = vpop.f32.mrf.mxu1 }
 0x567   :  { %v1471_v62 = vadd.f32 %v1470_v60, %v1461_v61 }
 0x569   :  { %v1472_v63 = vadd.f32 %v2025_v59, %v1471_v62 }
 0x56b   :  { %v1473_v2 = vrot.slane %v1472_v63, 4 }
 0x56d   :  { %v1474_v3 = vadd.f32 %v1473_v2, %v1472_v63 }
 0x56f   :  { %v1475_v4 = vrot.slane %v1474_v3, 2 }
 0x571   :  { %v1476_v6 = vadd.f32 %v1475_v4, %v1474_v3 }
 0x573   :  { %v1477_v7 = vrot.slane %v1476_v6, 1 }
 0x575   :  { %v1478_v8 = vadd.f32 %v1477_v7, %v1476_v6 }
 0x577   :  { %v1479_v28 = vmul.f32 0.03125, %v1478_v8 }
 0x579   :  { %v1480_v9 = vsub.f32 %v1365_v48, %v1479_v28  ;;  %v1481_v10 = vsub.f32 %v1366_v5, %v1479_v28  ;;  %v1482_v11 = vsub.f32 %v1367_v54, %v1479_v28  ;;  %v1483_v14 = vsub.f32 %v1368_v56, %v1479_v28 }
 0x57b   :  { %v1484_v12 = vmul.f32 %v1480_v9, %v1480_v9  ;;  %v1485_v13 = vmul.f32 %v1481_v10, %v1481_v10  ;;  %v1486_v15 = vmul.f32 %v1482_v11, %v1482_v11  ;;  %v1487_v16 = vmul.f32 %v1483_v14, %v1483_v14 }
 0x57d   :  { %2058 = vmatprep.mubr.f32.mxu0 %v1484_v12 }
 0x57e   :  { %2059 = vmatmul.mubr.f32.vlgmr.msra.gmra.mxu0 %v1485_v13 }
 0x57f   :  { %2061 = vmatprep.mubr.f32.mxu0 %v1486_v15 }
 0x582   :  { %2062 = vmatmul.mubr.f32.gmra.mxu0 %v1487_v16 }
 0x63e   :  { %v2060_v17 = vpop.f32.mrf.mxu0 }
 0x640   :  { %v1554_v18 = vpop.f32.mrf.mxu0 }
 0x641   :  { %v1573_v20 = vadd.f32 %v2060_v17, %v1554_v18 }
 0x642   :  { %v2063_v19 = vpop.f32.mrf.mxu0 }
 0x644   :  { %v1564_v21 = vpop.f32.mrf.mxu0 }
 0x645   :  { %v1574_v22 = vadd.f32 %v1573_v20, %v1564_v21 }
 0x647   :  { %v1575_v0 = vadd.f32 %v2063_v19, %v1574_v22 }
 0x649   :  { %v1576_v24 = vrot.slane %v1575_v0, 4 }
 0x64b   :  { %v1577_v26 = vadd.f32 %v1576_v24, %v1575_v0 }
 0x64d   :  { %v1578_v1 = vrot.slane %v1577_v26, 2 }
 0x64f   :  { %v1579_v27 = vadd.f32 %v1578_v1, %v1577_v26 }
 0x651   :  { %v1580_v29 = vrot.slane %v1579_v27, 1 }
 0x653   :  { %v1581_v30 = vadd.f32 %v1580_v29, %v1579_v27 }
 0x655   :  { %v1582_v31 = vmul.f32 0.03125, %v1581_v30 }
 0x657   :  { %v1583_v32 = vadd.f32 1e-05, %v1582_v31 }
 0x659   :  { %2137 = vrsqrt.f32 %v1583_v32 }
 0x666   :  { %v2138_v34 = vpop.eup %2137 }
 0x667   :  { %v1586_v35 = vmul.f32 %v2138_v34, %v1585_v33 }
 0x669   :  { %v1590_v36 = vrot.slane %v1586_v35, %v997_v25 }
 0x66b   :  { %v1591_v38 = vmul.f32 %v1590_v36, %v1480_v9  ;;  %v1592_v39 = vmul.f32 %v1590_v36, %v1481_v10  ;;  %v1593_v40 = vmul.f32 %v1590_v36, %v1482_v11  ;;  %v1594_v41 = vmul.f32 %v1590_v36, %v1483_v14 }
 0x66d   :  { %v1602_v42 = vadd.f32 %v1801_v37, %v1591_v38  ;;  %v1603_v43 = vadd.f32 %v1801_v37, %v1592_v39  ;;  %v1604_v44 = vadd.f32 %v1801_v37, %v1593_v40  ;;  %v1605_v45 = vadd.f32 %v1801_v37, %v1594_v41 }
 0x66f   :  { %vm1606_vm3 = vcmp.gt.f32.partialorder %v1602_v42, 0.0  ;;  %vm1607_vm4 = vcmp.gt.f32.partialorder %v1603_v43, 0.0  ;;  %vm1608_vm5 = vcmp.gt.f32.partialorder %v1604_v44, 0.0  ;;  %vm1609_vm6 = vcmp.gt.f32.partialorder %v1605_v45, 0.0 }
 0x670   :  { %v1610_v23 = vmul.f32 0.01, %v1602_v42  ;;  %v1611_v25 = vmul.f32 0.01, %v1603_v43  ;;  %v1612_v46 = vmul.f32 0.01, %v1604_v44 }
 0x671   :  { %v1613_v47 = vmul.f32 0.01, %v1605_v45 }
 0x672   :  { %v1614_v48 = vsel %vm1606_vm3, %v1602_v42, %v1610_v23  ;;  %v1615_v49 = vsel %vm1607_vm4, %v1603_v43, %v1611_v25  ;;  %v1616_v50 = vsel %vm1608_vm5, %v1604_v44, %v1612_v46 }
 0x673   :  { %v1617_v51 = vsel %vm1609_vm6, %v1605_v45, %v1613_v47  ;;  %1618 = vst [vmem:[#allocation4] sm:$0xff] %v1614_v48  ;;  %1619 = vst [vmem:[#allocation4 + $0x8] sm:$0xff] %v1615_v49 }
 0x674   :  { %1620 = vst [vmem:[#allocation4 + $0x10] sm:$0xff] %v1616_v50  ;;  %1621 = vst [vmem:[#allocation4 + $0x18] sm:$0xff] %v1617_v51 }
 0x675   :  { %2150 = shalt.err (!%p2147_p4)
}
 0x676   :  { %s2163_s10 = smov 128   ;;  %s2164_s25 = smov 8  }
 0x677   :  { %1633 = dma.vmem_to_hbm [thread:$0]  %s1628_s24, 512, %s2668_s11, [#allocation5], %s2163_s10, %s2163_s10, %s2164_s25  }
 0x678   :  { %2159 = dma.done.wait [#allocation5], 512  }
 0x679   :  { %2160 = vsyncadd [#allocation5], 4294966784 }
 0x67a   :  { %1637 = vsyncpa [#allocation5], 1 }

</bundles_post_ra>
